<compile_context>
chip_gen: v7x
topology: tpu7x:2x2x1
jax: 0.10.0
libtpu: 0.0.40
codegen_flags: <defaults>
</compile_context>

<pallas_src>
import jax
import jax.numpy as jnp
from jax.experimental import pallas as pl
from jax.experimental.pallas import tpu as pltpu


NEG_SLOPE = 0.01  # nn.LeakyReLU default
LANE = 128


def _round_up(v, m):
    return ((v + m - 1) // m) * m


def _leaky_relu(h):
    return jnp.maximum(h, NEG_SLOPE * h)


def dqn_mlp_kernel(x_ref,
                   w1_ref, b1_ref,
                   w2_ref, b2_ref,
                   w3_ref, b3_ref,
                   w4_ref, b4_ref,
                   w5_ref, b5_ref,
                   w6_ref, b6_ref,
                   out_ref):
    # Activations are carried in bf16 for the MXU; accumulation / bias /
    # activation math stays in f32.
    h = x_ref[...].astype(jnp.bfloat16)
    for w_ref, b_ref in ((w1_ref, b1_ref), (w2_ref, b2_ref), (w3_ref, b3_ref),
                         (w4_ref, b4_ref), (w5_ref, b5_ref)):
        h = jnp.dot(h, w_ref[...], preferred_element_type=jnp.float32) + b_ref[...]
        h = _leaky_relu(h).astype(jnp.bfloat16)

    h = jnp.dot(h, w6_ref[...], preferred_element_type=jnp.float32) + b6_ref[...]
    out_ref[...] = h.astype(out_ref.dtype)


def dqn_forward(x, params):
    """x: (B, observation_size) f32. params: list of (W(in,out) bf16, b(1,out) f32)."""
    B, obs = x.shape
    action_size = params[-1][0].shape[1]

    # Lane-dense output: pad the final layer's out-features to a multiple of 128.
    out_pad = _round_up(action_size, LANE)
    w6, b6 = params[-1]
    w6p = jnp.zeros((w6.shape[0], out_pad), w6.dtype).at[:, :action_size].set(w6)
    b6p = jnp.zeros((1, out_pad), b6.dtype).at[:, :action_size].set(b6)
    layers = list(params[:-1]) + [(w6p, b6p)]

    # Batch tiling: big batches in 256-row tiles; tiny batches padded to 8 rows.
    tb = 256 if B >= 256 else _round_up(B, 8)
    bp = _round_up(B, tb)
    xp = x if bp == B else jnp.pad(x, ((0, bp - B), (0, 0)))

    flat = [xp]
    in_specs = [pl.BlockSpec((tb, obs), lambda i: (i, 0))]
    for w, b in layers:
        flat.append(w)
        in_specs.append(pl.BlockSpec(w.shape, lambda i: (0, 0)))  # VMEM-resident
        flat.append(b)
        in_specs.append(pl.BlockSpec(b.shape, lambda i: (0, 0)))  # VMEM-resident

    out = pl.pallas_call(
        dqn_mlp_kernel,
        out_shape=jax.ShapeDtypeStruct((bp, out_pad), jnp.float32),
        grid=(bp // tb,),
        in_specs=in_specs,
        out_specs=pl.BlockSpec((tb, out_pad), lambda i: (i, 0)),
        compiler_params=pltpu.CompilerParams(
            dimension_semantics=("parallel",)),
    )(*flat)
    return out[:B, :action_size]


def init_params(key, observation_size, action_size):
    """Deterministic PyTorch-style init: U(-1/sqrt(fan_in), 1/sqrt(fan_in)).

    Weights are stored (in, out) in bf16 (fed straight to the MXU); biases f32.
    """
    dims = [observation_size, 1024, 512, 256, 128, 64, action_size]
    params = []
    for i in range(len(dims) - 1):
        fan_in, fan_out = dims[i], dims[i + 1]
        key, kw, kb = jax.random.split(key, 3)
        bound = 1.0 / jnp.sqrt(jnp.float32(fan_in))
        w = jax.random.uniform(kw, (fan_in, fan_out), jnp.float32, -bound, bound)
        b = jax.random.uniform(kb, (1, fan_out), jnp.float32, -bound, bound)
        params.append((w.astype(jnp.bfloat16), b))
    return params


def reference_forward(x, params):
    """Pure-JAX reference mirroring the kernel's bf16-weight quantization."""
    h = x
    n = len(params)
    for i, (w, b) in enumerate(params):
        h = jnp.dot(h.astype(jnp.bfloat16).astype(jnp.float32),
                    w.astype(jnp.float32),
                    precision=jax.lax.Precision.HIGHEST) + b
        if i < n - 1:
            h = jnp.maximum(h, NEG_SLOPE * h)
    return h


if __name__ == "__main__":
    observation_size = 16
    action_size = 4
    batch = 8

    key = jax.random.PRNGKey(0)
    key, kx = jax.random.split(key)
    x = jax.random.normal(kx, (batch, observation_size), jnp.float32)

    params = init_params(key, observation_size, action_size)

    out = dqn_forward(x, params)
    out = jax.block_until_ready(out)

    ref = reference_forward(x, params)
    assert out.shape == (batch, action_size), out.shape
    assert jnp.allclose(out, ref, atol=2e-3, rtol=2e-3), (
        float(jnp.max(jnp.abs(out - ref))))

    print("KERNEL_OK")
</pallas_src>

<mosaic_0001>
module attributes {stable_mosaic.version = 11 : i64} {
  func.func @dqn_mlp_kernel(%arg0: i32, %arg1: memref<8x16xf32, #tpu.memory_space<vmem>>, %arg2: memref<16x1024xbf16, #tpu.memory_space<vmem>>, %arg3: memref<1x1024xf32, #tpu.memory_space<vmem>>, %arg4: memref<1024x512xbf16, #tpu.memory_space<vmem>>, %arg5: memref<1x512xf32, #tpu.memory_space<vmem>>, %arg6: memref<512x256xbf16, #tpu.memory_space<vmem>>, %arg7: memref<1x256xf32, #tpu.memory_space<vmem>>, %arg8: memref<256x128xbf16, #tpu.memory_space<vmem>>, %arg9: memref<1x128xf32, #tpu.memory_space<vmem>>, %arg10: memref<128x64xbf16, #tpu.memory_space<vmem>>, %arg11: memref<1x64xf32, #tpu.memory_space<vmem>>, %arg12: memref<64x128xbf16, #tpu.memory_space<vmem>>, %arg13: memref<1x128xf32, #tpu.memory_space<vmem>>, %arg14: memref<8x128xf32, #tpu.memory_space<vmem>>) attributes {dimension_semantics = [#tpu.dimension_semantics<parallel>], iteration_bounds = array<i64: 1>, scalar_prefetch = 0 : i64, scratch_operands = 0 : i64, tpu.core_type = #tpu.core_type<tc>, window_params = [{transform_indices = @transform_0, window_bounds = array<i64: 8, 16>}, {pipeline_mode = #tpu.pipeline_mode<synchronous>, transform_indices = @transform_1, window_bounds = array<i64: 16, 1024>}, {pipeline_mode = #tpu.pipeline_mode<synchronous>, transform_indices = @transform_2, window_bounds = array<i64: 1, 1024>}, {pipeline_mode = #tpu.pipeline_mode<synchronous>, transform_indices = @transform_3, window_bounds = array<i64: 1024, 512>}, {pipeline_mode = #tpu.pipeline_mode<synchronous>, transform_indices = @transform_4, window_bounds = array<i64: 1, 512>}, {pipeline_mode = #tpu.pipeline_mode<synchronous>, transform_indices = @transform_5, window_bounds = array<i64: 512, 256>}, {pipeline_mode = #tpu.pipeline_mode<synchronous>, transform_indices = @transform_6, window_bounds = array<i64: 1, 256>}, {pipeline_mode = #tpu.pipeline_mode<synchronous>, transform_indices = @transform_7, window_bounds = array<i64: 256, 128>}, {pipeline_mode = #tpu.pipeline_mode<synchronous>, transform_indices = @transform_8, window_bounds = array<i64: 1, 128>}, {pipeline_mode = #tpu.pipeline_mode<synchronous>, transform_indices = @transform_9, window_bounds = array<i64: 128, 64>}, {pipeline_mode = #tpu.pipeline_mode<synchronous>, transform_indices = @transform_10, window_bounds = array<i64: 1, 64>}, {pipeline_mode = #tpu.pipeline_mode<synchronous>, transform_indices = @transform_11, window_bounds = array<i64: 64, 128>}, {pipeline_mode = #tpu.pipeline_mode<synchronous>, transform_indices = @transform_12, window_bounds = array<i64: 1, 128>}, {transform_indices = @transform_13, window_bounds = array<i64: 8, 128>}]} {
    %c0 = arith.constant 0 : index
    %c0_0 = arith.constant 0 : index
    %0 = vector.load %arg1[%c0, %c0_0] : memref<8x16xf32, #tpu.memory_space<vmem>>, vector<8x16xf32>
    %1 = arith.truncf %0 : vector<8x16xf32> to vector<8x16xbf16>
    %c0_1 = arith.constant 0 : index
    %c0_2 = arith.constant 0 : index
    %2 = vector.load %arg2[%c0_1, %c0_2] : memref<16x1024xbf16, #tpu.memory_space<vmem>>, vector<16x1024xbf16>
    %cst = arith.constant dense<0.000000e+00> : vector<8x1024xf32>
    %3 = tpu.matmul %1, %2, %cst {dimension_numbers = #tpu.dot_dimension_numbers<[1], [0], [0], [1], [0, 0, 1, 1], [], []>} : vector<8x16xbf16>, vector<16x1024xbf16>, vector<8x1024xf32> -> vector<8x1024xf32>
    %c0_3 = arith.constant 0 : index
    %c0_4 = arith.constant 0 : index
    %4 = vector.load %arg3[%c0_3, %c0_4] : memref<1x1024xf32, #tpu.memory_space<vmem>>, vector<1x1024xf32>
    %5 = vector.broadcast %4 : vector<1x1024xf32> to vector<8x1024xf32>
    %6 = arith.addf %3, %5 : vector<8x1024xf32>
    %cst_5 = arith.constant 0.00999999977 : f32
    %7 = vector.broadcast %cst_5 : f32 to vector<8x1024xf32>
    %8 = arith.mulf %7, %6 : vector<8x1024xf32>
    %9 = arith.maximumf %6, %8 : vector<8x1024xf32>
    %10 = arith.truncf %9 : vector<8x1024xf32> to vector<8x1024xbf16>
    %c0_6 = arith.constant 0 : index
    %c0_7 = arith.constant 0 : index
    %11 = vector.load %arg4[%c0_6, %c0_7] : memref<1024x512xbf16, #tpu.memory_space<vmem>>, vector<1024x512xbf16>
    %cst_8 = arith.constant dense<0.000000e+00> : vector<8x512xf32>
    %12 = tpu.matmul %10, %11, %cst_8 {dimension_numbers = #tpu.dot_dimension_numbers<[1], [0], [0], [1], [0, 0, 1, 1], [], []>} : vector<8x1024xbf16>, vector<1024x512xbf16>, vector<8x512xf32> -> vector<8x512xf32>
    %c0_9 = arith.constant 0 : index
    %c0_10 = arith.constant 0 : index
    %13 = vector.load %arg5[%c0_9, %c0_10] : memref<1x512xf32, #tpu.memory_space<vmem>>, vector<1x512xf32>
    %14 = vector.broadcast %13 : vector<1x512xf32> to vector<8x512xf32>
    %15 = arith.addf %12, %14 : vector<8x512xf32>
    %cst_11 = arith.constant 0.00999999977 : f32
    %16 = vector.broadcast %cst_11 : f32 to vector<8x512xf32>
    %17 = arith.mulf %16, %15 : vector<8x512xf32>
    %18 = arith.maximumf %15, %17 : vector<8x512xf32>
    %19 = arith.truncf %18 : vector<8x512xf32> to vector<8x512xbf16>
    %c0_12 = arith.constant 0 : index
    %c0_13 = arith.constant 0 : index
    %20 = vector.load %arg6[%c0_12, %c0_13] : memref<512x256xbf16, #tpu.memory_space<vmem>>, vector<512x256xbf16>
    %cst_14 = arith.constant dense<0.000000e+00> : vector<8x256xf32>
    %21 = tpu.matmul %19, %20, %cst_14 {dimension_numbers = #tpu.dot_dimension_numbers<[1], [0], [0], [1], [0, 0, 1, 1], [], []>} : vector<8x512xbf16>, vector<512x256xbf16>, vector<8x256xf32> -> vector<8x256xf32>
    %c0_15 = arith.constant 0 : index
    %c0_16 = arith.constant 0 : index
    %22 = vector.load %arg7[%c0_15, %c0_16] : memref<1x256xf32, #tpu.memory_space<vmem>>, vector<1x256xf32>
    %23 = vector.broadcast %22 : vector<1x256xf32> to vector<8x256xf32>
    %24 = arith.addf %21, %23 : vector<8x256xf32>
    %cst_17 = arith.constant 0.00999999977 : f32
    %25 = vector.broadcast %cst_17 : f32 to vector<8x256xf32>
    %26 = arith.mulf %25, %24 : vector<8x256xf32>
    %27 = arith.maximumf %24, %26 : vector<8x256xf32>
    %28 = arith.truncf %27 : vector<8x256xf32> to vector<8x256xbf16>
    %c0_18 = arith.constant 0 : index
    %c0_19 = arith.constant 0 : index
    %29 = vector.load %arg8[%c0_18, %c0_19] : memref<256x128xbf16, #tpu.memory_space<vmem>>, vector<256x128xbf16>
    %cst_20 = arith.constant dense<0.000000e+00> : vector<8x128xf32>
    %30 = tpu.matmul %28, %29, %cst_20 {dimension_numbers = #tpu.dot_dimension_numbers<[1], [0], [0], [1], [0, 0, 1, 1], [], []>} : vector<8x256xbf16>, vector<256x128xbf16>, vector<8x128xf32> -> vector<8x128xf32>
    %c0_21 = arith.constant 0 : index
    %c0_22 = arith.constant 0 : index
    %31 = vector.load %arg9[%c0_21, %c0_22] : memref<1x128xf32, #tpu.memory_space<vmem>>, vector<1x128xf32>
    %32 = vector.broadcast %31 : vector<1x128xf32> to vector<8x128xf32>
    %33 = arith.addf %30, %32 : vector<8x128xf32>
    %cst_23 = arith.constant 0.00999999977 : f32
    %34 = vector.broadcast %cst_23 : f32 to vector<8x128xf32>
    %35 = arith.mulf %34, %33 : vector<8x128xf32>
    %36 = arith.maximumf %33, %35 : vector<8x128xf32>
    %37 = arith.truncf %36 : vector<8x128xf32> to vector<8x128xbf16>
    %c0_24 = arith.constant 0 : index
    %c0_25 = arith.constant 0 : index
    %38 = vector.load %arg10[%c0_24, %c0_25] : memref<128x64xbf16, #tpu.memory_space<vmem>>, vector<128x64xbf16>
    %cst_26 = arith.constant dense<0.000000e+00> : vector<8x64xf32>
    %39 = tpu.matmul %37, %38, %cst_26 {dimension_numbers = #tpu.dot_dimension_numbers<[1], [0], [0], [1], [0, 0, 1, 1], [], []>} : vector<8x128xbf16>, vector<128x64xbf16>, vector<8x64xf32> -> vector<8x64xf32>
    %c0_27 = arith.constant 0 : index
    %c0_28 = arith.constant 0 : index
    %40 = vector.load %arg11[%c0_27, %c0_28] : memref<1x64xf32, #tpu.memory_space<vmem>>, vector<1x64xf32>
    %41 = vector.broadcast %40 : vector<1x64xf32> to vector<8x64xf32>
    %42 = arith.addf %39, %41 : vector<8x64xf32>
    %cst_29 = arith.constant 0.00999999977 : f32
    %43 = vector.broadcast %cst_29 : f32 to vector<8x64xf32>
    %44 = arith.mulf %43, %42 : vector<8x64xf32>
    %45 = arith.maximumf %42, %44 : vector<8x64xf32>
    %46 = arith.truncf %45 : vector<8x64xf32> to vector<8x64xbf16>
    %c0_30 = arith.constant 0 : index
    %c0_31 = arith.constant 0 : index
    %47 = vector.load %arg12[%c0_30, %c0_31] : memref<64x128xbf16, #tpu.memory_space<vmem>>, vector<64x128xbf16>
    %cst_32 = arith.constant dense<0.000000e+00> : vector<8x128xf32>
    %48 = tpu.matmul %46, %47, %cst_32 {dimension_numbers = #tpu.dot_dimension_numbers<[1], [0], [0], [1], [0, 0, 1, 1], [], []>} : vector<8x64xbf16>, vector<64x128xbf16>, vector<8x128xf32> -> vector<8x128xf32>
    %c0_33 = arith.constant 0 : index
    %c0_34 = arith.constant 0 : index
    %49 = vector.load %arg13[%c0_33, %c0_34] : memref<1x128xf32, #tpu.memory_space<vmem>>, vector<1x128xf32>
    %50 = vector.broadcast %49 : vector<1x128xf32> to vector<8x128xf32>
    %51 = arith.addf %48, %50 : vector<8x128xf32>
    %c0_35 = arith.constant 0 : index
    %c0_36 = arith.constant 0 : index
    %52 = vector.load %arg14[%c0_35, %c0_36] : memref<8x128xf32, #tpu.memory_space<vmem>>, vector<8x128xf32>
    tpu.vector_store %arg14[%c0_35, %c0_36], %51 {strides = array<i32>} : memref<8x128xf32, #tpu.memory_space<vmem>>, vector<8x128xf32>,
    return
  }
  func.func @transform_0(%arg0: i32) -> (i32, i32) {
    %c0_i32 = arith.constant 0 : i32
    %c0_i32_0 = arith.constant 0 : i32
    return %arg0, %c0_i32 : i32, i32
  }
  func.func @transform_1(%arg0: i32) -> (i32, i32) {
    %c0_i32 = arith.constant 0 : i32
    %c0_i32_0 = arith.constant 0 : i32
    %c0_i32_1 = arith.constant 0 : i32
    return %c0_i32, %c0_i32_0 : i32, i32
  }
  func.func @transform_2(%arg0: i32) -> (i32, i32) {
    %c0_i32 = arith.constant 0 : i32
    %c0_i32_0 = arith.constant 0 : i32
    %c0_i32_1 = arith.constant 0 : i32
    return %c0_i32, %c0_i32_0 : i32, i32
  }
  func.func @transform_3(%arg0: i32) -> (i32, i32) {
    %c0_i32 = arith.constant 0 : i32
    %c0_i32_0 = arith.constant 0 : i32
    %c0_i32_1 = arith.constant 0 : i32
    return %c0_i32, %c0_i32_0 : i32, i32
  }
  func.func @transform_4(%arg0: i32) -> (i32, i32) {
    %c0_i32 = arith.constant 0 : i32
    %c0_i32_0 = arith.constant 0 : i32
    %c0_i32_1 = arith.constant 0 : i32
    return %c0_i32, %c0_i32_0 : i32, i32
  }
  func.func @transform_5(%arg0: i32) -> (i32, i32) {
    %c0_i32 = arith.constant 0 : i32
    %c0_i32_0 = arith.constant 0 : i32
    %c0_i32_1 = arith.constant 0 : i32
    return %c0_i32, %c0_i32_0 : i32, i32
  }
  func.func @transform_6(%arg0: i32) -> (i32, i32) {
    %c0_i32 = arith.constant 0 : i32
    %c0_i32_0 = arith.constant 0 : i32
    %c0_i32_1 = arith.constant 0 : i32
    return %c0_i32, %c0_i32_0 : i32, i32
  }
  func.func @transform_7(%arg0: i32) -> (i32, i32) {
    %c0_i32 = arith.constant 0 : i32
    %c0_i32_0 = arith.constant 0 : i32
    %c0_i32_1 = arith.constant 0 : i32
    return %c0_i32, %c0_i32_0 : i32, i32
  }
  func.func @transform_8(%arg0: i32) -> (i32, i32) {
    %c0_i32 = arith.constant 0 : i32
    %c0_i32_0 = arith.constant 0 : i32
    %c0_i32_1 = arith.constant 0 : i32
    return %c0_i32, %c0_i32_0 : i32, i32
  }
  func.func @transform_9(%arg0: i32) -> (i32, i32) {
    %c0_i32 = arith.constant 0 : i32
    %c0_i32_0 = arith.constant 0 : i32
    %c0_i32_1 = arith.constant 0 : i32
    return %c0_i32, %c0_i32_0 : i32, i32
  }
  func.func @transform_10(%arg0: i32) -> (i32, i32) {
    %c0_i32 = arith.constant 0 : i32
    %c0_i32_0 = arith.constant 0 : i32
    %c0_i32_1 = arith.constant 0 : i32
    return %c0_i32, %c0_i32_0 : i32, i32
  }
  func.func @transform_11(%arg0: i32) -> (i32, i32) {
    %c0_i32 = arith.constant 0 : i32
    %c0_i32_0 = arith.constant 0 : i32
    %c0_i32_1 = arith.constant 0 : i32
    return %c0_i32, %c0_i32_0 : i32, i32
  }
  func.func @transform_12(%arg0: i32) -> (i32, i32) {
    %c0_i32 = arith.constant 0 : i32
    %c0_i32_0 = arith.constant 0 : i32
    %c0_i32_1 = arith.constant 0 : i32
    return %c0_i32, %c0_i32_0 : i32, i32
  }
  func.func @transform_13(%arg0: i32) -> (i32, i32) {
    %c0_i32 = arith.constant 0 : i32
    %c0_i32_0 = arith.constant 0 : i32
    return %arg0, %c0_i32 : i32, i32
  }
}

</mosaic_0001>

<bundles_post_ra>
// kernel: tpu_custom_call.1
= control target key start
LH: loop header
LB: loop body
LE: loop exit
PB: predicated region body
PF: predicated region fallthrough
CT: control target
= control target key end

     0   :  { %18 = vsyncpa [#allocation3], 0  ;;  %s4704_s0 = inlined_call_operand.hbm [shape: f32[8,16], index: 0, kind: input, shape index: {}]   ;;  %s4705_s1 = inlined_call_operand.vmem [shape: bf16[16,1024], index: 1, kind: input, shape index: {}]   ;;  %s4706_s2 = inlined_call_operand.hbm [shape: f32[1,1024], index: 2, kind: input, shape index: {}]   ;;  %s4707_s3 = inlined_call_operand.hbm [shape: bf16[1024,512], index: 3, kind: input, shape index: {}]   ;;  %s4708_s4 = inlined_call_operand.hbm [shape: f32[1,512], index: 4, kind: input, shape index: {}]   ;;  %s4709_s5 = inlined_call_operand.hbm [shape: bf16[512,256], index: 5, kind: input, shape index: {}]   ;;  %s4710_s6 = inlined_call_operand.vmem [shape: f32[1,256], index: 6, kind: input, shape index: {}]   ;;  %s4711_s7 = inlined_call_operand.hbm [shape: bf16[256,128], index: 7, kind: input, shape index: {}]   ;;  %s4712_s8 = inlined_call_operand.hbm [shape: f32[1,128], index: 8, kind: input, shape index: {}]   ;;  %s4713_s9 = inlined_call_operand.vmem [shape: bf16[128,64], index: 9, kind: input, shape index: {}]   ;;  %s4714_s10 = inlined_call_operand.vmem [shape: f32[1,64], index: 10, kind: input, shape index: {}]   ;;  %s4715_s11 = inlined_call_operand.vmem [shape: bf16[64,128], index: 11, kind: input, shape index: {}]   ;;  %s4716_s12 = inlined_call_operand.vmem [shape: f32[1,128], index: 12, kind: input, shape index: {}]   ;;  %s4717_s13 = inlined_call_operand.hbm [shape: f32[8,128], index: 13, kind: output, shape index: {}]  }
   0x1   :  { %19 = vsyncpa [#allocation6], 0 }
   0x2   :  { %20 = vsyncpa [#allocation9], 0 }
   0x3   :  { %21 = vsyncpa [#allocation12], 0 }
   0x4   :  { %22 = vsyncpa [#allocation4], 0  ;;  %s4370_s25 = smov [#allocation5]   ;;  %s4371_s27 = smov [#allocation8]  }
   0x5   :  { %s41_s26 = sshll.u32 %s4370_s25, 4  ;;  %s63_s28 = sshll.u32 %s4371_s27, 4  ;;  %s42_s26 = int_to_ptr.vmem [resolvable:$true] %s41_s26  ;;  %s64_s28 = int_to_ptr.vmem [resolvable:$true] %s63_s28 }
   0x6   :  { %s4184_s14 = scalar_lea.hbm %s4706_s2, 128 }
   0x7   :  { %p4185_p0 = scmp.ne.s32.totalorder %s4706_s2, %s4184_s14  ;;  %p4188_p1 = scmp.lt.u32.totalorder %s4184_s14, %s4706_s2 }
   0x9   :  { %p4190_p2 = pnand %p4188_p1, %p4185_p0 }
   0xb   :  { %4193 = shalt.err (!%p4190_p2)
}
   0xc   :  { %s4194_s19 = scalar_lea.vmem %s42_s26, 128  ;;  %p4199_p4 = scmp.lt.s32.totalorder %s42_s26, %s42_s26 }
   0xd   :  { %p4195_p3 = scmp.ne.s32.totalorder %s42_s26, %s4194_s19  ;;  %p4200_p5 = scmp.lt.s32.totalorder %s4194_s19, %s4194_s19 }
   0xf   :  { %p4201_p6 = por %p4200_p5, %p4199_p4 }
  0x11   :  { %p4202_p7 = pnand %p4201_p6, %p4195_p3 }
  0x13   :  { %4205 = shalt.err (!%p4202_p7)
}
  0x14   :  { %44 = dma.hbm_to_vmem [thread:$0]  %s4706_s2, 128, %s42_s26, [#allocation6]  }
  0x15   :  { %s4206_s24 = scalar_lea.hbm %s4708_s4, 64 }
  0x16   :  { %p4207_p8 = scmp.ne.s32.totalorder %s4708_s4, %s4206_s24  ;;  %p4210_p9 = scmp.lt.u32.totalorder %s4206_s24, %s4708_s4 }
  0x18   :  { %p4212_p10 = pnand %p4210_p9, %p4207_p8 }
  0x1a   :  { %4215 = shalt.err (!%p4212_p10)
}
  0x1b   :  { %s4216_s14 = scalar_lea.vmem %s64_s28, 64  ;;  %p4221_p12 = scmp.lt.s32.totalorder %s64_s28, %s64_s28 }
  0x1c   :  { %p4217_p11 = scmp.ne.s32.totalorder %s64_s28, %s4216_s14  ;;  %p4222_p13 = scmp.lt.s32.totalorder %s4216_s14, %s4216_s14 }
  0x1e   :  { %p4223_p0 = por %p4222_p13, %p4221_p12 }
  0x20   :  { %p4224_p1 = pnand %p4223_p0, %p4217_p11 }
  0x22   :  { %4227 = shalt.err (!%p4224_p1)
}
  0x23   :  { %66 = dma.hbm_to_vmem [thread:$0]  %s4708_s4, 64, %s64_s28, [#allocation9]  }
  0x24   :  { %s4372_s15 = smov [#allocation11]   ;;  %s4228_s19 = scalar_lea.hbm %s4711_s7, 2048 }
  0x25   :  { %s86_s16 = sshll.u32 %s4372_s15, 4  ;;  %p4229_p2 = scmp.ne.s32.totalorder %s4711_s7, %s4228_s19  ;;  %s87_s16 = int_to_ptr.vmem [resolvable:$true] %s86_s16 }
  0x26   :  { %p4232_p3 = scmp.lt.u32.totalorder %s4228_s19, %s4711_s7 }
  0x28   :  { %p4234_p4 = pnand %p4232_p3, %p4229_p2 }
  0x2a   :  { %4237 = shalt.err (!%p4234_p4)
}
  0x2b   :  { %s4238_s24 = scalar_lea.vmem %s87_s16, 2048  ;;  %p4243_p6 = scmp.lt.s32.totalorder %s87_s16, %s87_s16 }
  0x2c   :  { %p4239_p5 = scmp.ne.s32.totalorder %s87_s16, %s4238_s24  ;;  %p4244_p7 = scmp.lt.s32.totalorder %s4238_s24, %s4238_s24 }
  0x2e   :  { %p4245_p8 = por %p4244_p7, %p4243_p6 }
  0x30   :  { %p4246_p9 = pnand %p4245_p8, %p4239_p5 }
  0x32   :  { %4249 = shalt.err (!%p4246_p9)
}
  0x33   :  { %s4373_s4 = smov 64   ;;  %s4374_s28 = smov 4  }
  0x34   :  { %92 = dma.hbm_to_vmem [thread:$0]  %s4711_s7, 2048, %s87_s16, [#allocation12], %s4373_s4, %s4373_s4, %s4374_s28  }
  0x35   :  { %s4375_s29 = smov [#allocation2]   ;;  %s4376_s14 = smov [#allocation7]  }
  0x36   :  { %s29_s30 = sshll.u32 %s4375_s29, 4  ;;  %s50_s2 = sshll.u32 %s4376_s14, 4  ;;  %s30_s30 = int_to_ptr.vmem [resolvable:$true] %s29_s30  ;;  %s51_s2 = int_to_ptr.vmem [resolvable:$true] %s50_s2 }
  0x37   :  { %s4250_s17 = scalar_lea.hbm %s4704_s0, 128 }
  0x38   :  { %p4251_p10 = scmp.ne.s32.totalorder %s4704_s0, %s4250_s17  ;;  %p4254_p11 = scmp.lt.u32.totalorder %s4250_s17, %s4704_s0 }
  0x3a   :  { %p4256_p12 = pnand %p4254_p11, %p4251_p10 }
  0x3c   :  { %4259 = shalt.err (!%p4256_p12)
}
  0x3d   :  { %s4260_s7 = scalar_lea.vmem %s30_s30, 128  ;;  %p4265_p0 = scmp.lt.s32.totalorder %s30_s30, %s30_s30 }
  0x3e   :  { %p4261_p13 = scmp.ne.s32.totalorder %s30_s30, %s4260_s7  ;;  %p4266_p1 = scmp.lt.s32.totalorder %s4260_s7, %s4260_s7 }
  0x40   :  { %p4267_p2 = por %p4266_p1, %p4265_p0 }
  0x42   :  { %p4268_p3 = pnand %p4267_p2, %p4261_p13 }
  0x44   :  { %4271 = shalt.err (!%p4268_p3)
}
  0x45   :  { %32 = dma.hbm_to_vmem [thread:$0]  %s4704_s0, 128, %s30_s30, [#allocation3]  }
  0x46   :  { %s4272_s4 = scalar_lea.hbm %s4707_s3, 32768 }
  0x47   :  { %p4273_p4 = scmp.ne.s32.totalorder %s4707_s3, %s4272_s4  ;;  %p4276_p5 = scmp.lt.u32.totalorder %s4272_s4, %s4707_s3 }
  0x49   :  { %p4278_p6 = pnand %p4276_p5, %p4273_p4 }
  0x4b   :  { %4281 = shalt.err (!%p4278_p6)
}
  0x4c   :  { %s4282_s14 = scalar_lea.vmem %s51_s2, 32768  ;;  %p4287_p8 = scmp.lt.s32.totalorder %s51_s2, %s51_s2 }
  0x4d   :  { %p4283_p7 = scmp.ne.s32.totalorder %s51_s2, %s4282_s14  ;;  %p4288_p9 = scmp.lt.s32.totalorder %s4282_s14, %s4282_s14 }
  0x4f   :  { %p4289_p10 = por %p4288_p9, %p4287_p8 }
  0x51   :  { %p4290_p11 = pnand %p4289_p10, %p4283_p7 }
  0x53   :  { %4293 = shalt.err (!%p4290_p11)
}
  0x54   :  { %s4377_s0 = smov 256   ;;  %s4378_s30 = smov 16  }
  0x55   :  { %56 = dma.hbm_to_vmem [thread:$0]  %s4707_s3, 32768, %s51_s2, [#allocation6], %s4377_s0, %s4377_s0, %s4378_s30  }
  0x56   :  { %s4379_s17 = smov [#allocation10]   ;;  %s4294_s21 = scalar_lea.hbm %s4709_s5, 8192 }
  0x57   :  { %s72_s18 = sshll.u32 %s4379_s17, 4  ;;  %p4295_p12 = scmp.ne.s32.totalorder %s4709_s5, %s4294_s21  ;;  %s73_s18 = int_to_ptr.vmem [resolvable:$true] %s72_s18 }
  0x58   :  { %p4298_p13 = scmp.lt.u32.totalorder %s4294_s21, %s4709_s5 }
  0x5a   :  { %p4300_p0 = pnand %p4298_p13, %p4295_p12 }
  0x5c   :  { %4303 = shalt.err (!%p4300_p0)
}
  0x5d   :  { %s4304_s24 = scalar_lea.vmem %s73_s18, 8192  ;;  %p4309_p2 = scmp.lt.s32.totalorder %s73_s18, %s73_s18 }
  0x5e   :  { %p4305_p1 = scmp.ne.s32.totalorder %s73_s18, %s4304_s24  ;;  %p4310_p3 = scmp.lt.s32.totalorder %s4304_s24, %s4304_s24 }
  0x60   :  { %p4311_p4 = por %p4310_p3, %p4309_p2 }
  0x62   :  { %p4312_p5 = pnand %p4311_p4, %p4305_p1 }
  0x64   :  { %4315 = shalt.err (!%p4312_p5)
}
  0x65   :  { %s4380_s3 = smov 128   ;;  %s4381_s2 = smov 8  }
  0x66   :  { %78 = dma.hbm_to_vmem [thread:$0]  %s4709_s5, 8192, %s73_s18, [#allocation9], %s4380_s3, %s4380_s3, %s4381_s2  }
  0x67   :  { %s4382_s25 = smov [#allocation13]   ;;  %s4316_s0 = scalar_lea.hbm %s4712_s8, 16 }
  0x68   :  { %s99_s27 = sshll.u32 %s4382_s25, 4  ;;  %p4317_p6 = scmp.ne.s32.totalorder %s4712_s8, %s4316_s0  ;;  %s100_s27 = int_to_ptr.vmem [resolvable:$true] %s99_s27 }
  0x69   :  { %p4320_p7 = scmp.lt.u32.totalorder %s4316_s0, %s4712_s8 }
  0x6b   :  { %p4322_p8 = pnand %p4320_p7, %p4317_p6 }
  0x6d   :  { %4325 = shalt.err (!%p4322_p8)
}
  0x6e   :  { %s4326_s19 = scalar_lea.vmem %s100_s27, 16  ;;  %s4330_s5 = scalar_lea.vmem %s100_s27, 32 }
  0x6f   :  { %p4327_p9 = scmp.ne.s32.totalorder %s100_s27, %s4326_s19  ;;  %p4331_p10 = scmp.lt.s32.totalorder %s100_s27, %s100_s27 }
  0x70   :  { %p4332_p11 = scmp.lt.s32.totalorder %s4330_s5, %s4326_s19 }
  0x72   :  { %p4333_p12 = por %p4332_p11, %p4331_p10 }
  0x74   :  { %p4334_p13 = pnand %p4333_p12, %p4327_p9 }
  0x76   :  { %4337 = shalt.err (!%p4334_p13)
}
  0x77   :  { %102 = dma.hbm_to_vmem [thread:$0]  %s4712_s8, 16, %s100_s27, [#allocation12]  }
  0x78   :  { %4360 = dma.done.wait [#allocation3], 128  }
  0x79   :  { %4361 = vsyncadd [#allocation3], 4294967168 }
  0x7a   :  { %4362 = dma.done.wait [#allocation6], 32896  }
  0x7b   :  { %4363 = vsyncadd [#allocation6], 4294934400 }
  0x7c   :  { %4364 = dma.done.wait [#allocation9], 8256  }
  0x7d   :  { %4365 = vsyncadd [#allocation9], 4294959040 }
  0x7e   :  { %4366 = dma.done.wait [#allocation12], 2064  }
  0x7f   :  { %4367 = vsyncadd [#allocation12], 4294965232  ;;  %v4383_v0 = vmov 0   ;;  %v135_v1 = vld [vmem:[%s4705_s1] sm:$0xff]  ;;  %v136_v6 = vld [vmem:[%s4705_s1 + $0x8] sm:$0xff]  ;;  %vm225_vm0 = vcmask 130048  }
  0x80   :  { %261 = vmatprep.mubr.bf16.mxu1 %v4383_v0  ;;  %v139_v2 = vld [vmem:[%s4705_s1 + $0x20] sm:$0xff]  ;;  %v140_v7 = vld [vmem:[%s4705_s1 + $0x28] sm:$0xff]  ;;  %v137_v9 = vld [vmem:[%s4705_s1 + $0x10] sm:$0xff]  ;;  %vm4385_vm1 = vmmov 0   ;;  %vm3130_vm2 = vcmask 523264  }
  0x81   :  { %v133_v3 = vld [vmem:[#allocation2] sm:$0xff]  ;;  %v3194_v4 = vcombine.high %v135_v1, %v139_v2  ;;  %v3193_v5 = vcombine.low %v135_v1, %v139_v2  ;;  %v3196_v8 = vcombine.high %v136_v6, %v140_v7  ;;  %v141_v10 = vld [vmem:[%s4705_s1 + $0x30] sm:$0xff]  ;;  %v3195_v13 = vcombine.low %v136_v6, %v140_v7  ;;  %v138_v19 = vld [vmem:[%s4705_s1 + $0x18] sm:$0xff] }
  0x82   :  { %v134_v11 = vpack.c.bf16 %v133_v3, %v133_v3  ;;  %v3676_v12 = vld [vmem:[#allocation7 + $0x4] ss:$16 sps:$4 sm:$0xff]   ;;  %v3198_v14 = vcombine.high %v137_v9, %v141_v10  ;;  %v3681_v15 = vld [vmem:[#allocation7] ss:$16 sps:$4 sm:$0xff]   ;;  %v142_v20 = vld [vmem:[%s4705_s1 + $0x38] sm:$0xff]  ;;  %v3197_v22 = vcombine.low %v137_v9, %v141_v10 }
  0x83   :  { %229 = vmatprep.subr.bf16.mxu1 %v3194_v4  ;;  %1975 = vmatprep.subr.bf16.mxu0 %v3676_v12  ;;  %v3682_v16 = vld [vmem:[#allocation7 + $0x24] ss:$16 sps:$4 sm:$0xff]   ;;  %v3687_v17 = vld [vmem:[#allocation7 + $0x20] ss:$16 sps:$4 sm:$0xff]   ;;  %v3200_v23 = vcombine.high %v138_v19, %v142_v20  ;;  %v3199_v28 = vcombine.low %v138_v19, %v142_v20  ;;  %v3680_v29 = vld [vmem:[#allocation7 + $0xc] ss:$16 sps:$4 sm:$0xff]  }
  0x84   :  { %230 = vmatpush1.bf16.msra.mxu1 %v3193_v5  ;;  %1976 = vmatpush1.bf16.msra.mxu0 %v3681_v15  ;;  %v3688_v18 = vld [vmem:[#allocation7 + $0x44] ss:$16 sps:$4 sm:$0xff]   ;;  %v3693_v21 = vld [vmem:[#allocation7 + $0x40] ss:$16 sps:$4 sm:$0xff]   ;;  %v3678_v33 = vld [vmem:[#allocation7 + $0x8] ss:$16 sps:$4 sm:$0xff]  }
  0x85   :  { %270 = vmatprep.subr.bf16.mxu1 %v3196_v8  ;;  %1977 = vmatprep.subr.bf16.mxu0 %v3682_v16  ;;  %v3694_v24 = vld [vmem:[#allocation7 + $0x64] ss:$16 sps:$4 sm:$0xff]   ;;  %v3699_v25 = vld [vmem:[#allocation7 + $0x60] ss:$16 sps:$4 sm:$0xff]   ;;  %v3686_v36 = vld [vmem:[#allocation7 + $0x2c] ss:$16 sps:$4 sm:$0xff]  }
  0x86   :  { %v3700_v26 = vld [vmem:[#allocation7 + $0x84] ss:$16 sps:$4 sm:$0xff]   ;;  %v3705_v27 = vld [vmem:[#allocation7 + $0x80] ss:$16 sps:$4 sm:$0xff]   ;;  %v3684_v37 = vld [vmem:[#allocation7 + $0x28] ss:$16 sps:$4 sm:$0xff]  }
  0x87   :  { %3201 = vmatmul.mubr.msk.bf16.vlgmr.msra.gmra.mrb[0].mxu1 %vm225_vm0, %v134_v11  ;;  %v3706_v30 = vld [vmem:[#allocation7 + $0xa4] ss:$16 sps:$4 sm:$0xff]   ;;  %v3711_v31 = vld [vmem:[#allocation7 + $0xa0] ss:$16 sps:$4 sm:$0xff]   ;;  %v3692_v40 = vld [vmem:[#allocation7 + $0x4c] ss:$16 sps:$4 sm:$0xff]  }
  0x88   :  { %271 = vmatpush1.bf16.msra.mxu1 %v3195_v13  ;;  %302 = vmatprep.mubr.bf16.mxu1 %v4383_v0  ;;  %v3712_v32 = vld [vmem:[#allocation7 + $0xc4] ss:$16 sps:$4 sm:$0xff]   ;;  %v3717_v34 = vld [vmem:[#allocation7 + $0xc0] ss:$16 sps:$4 sm:$0xff]   ;;  %v3690_v41 = vld [vmem:[#allocation7 + $0x48] ss:$16 sps:$4 sm:$0xff]  }
  0x89   :  { %311 = vmatprep.subr.bf16.mxu1 %v3198_v14  ;;  %1978 = vmatpush1.bf16.msra.mxu0 %v3687_v17  ;;  %v3718_v35 = vld [vmem:[#allocation7 + $0xe4] ss:$16 sps:$4 sm:$0xff]   ;;  %v3723_v38 = vld [vmem:[#allocation7 + $0xe0] ss:$16 sps:$4 sm:$0xff]   ;;  %v3698_v44 = vld [vmem:[#allocation7 + $0x6c] ss:$16 sps:$4 sm:$0xff]  }
  0x8a   :  { %1979 = vmatprep.subr.bf16.mxu0 %v3688_v18  ;;  %v3724_v39 = vld [vmem:[#allocation7 + $0x104] ss:$16 sps:$4 sm:$0xff]   ;;  %v3729_v42 = vld [vmem:[#allocation7 + $0x100] ss:$16 sps:$4 sm:$0xff]   ;;  %v3696_v45 = vld [vmem:[#allocation7 + $0x68] ss:$16 sps:$4 sm:$0xff]  }
  0x8b   :  { %v3730_v43 = vld [vmem:[#allocation7 + $0x124] ss:$16 sps:$4 sm:$0xff]   ;;  %v3735_v46 = vld [vmem:[#allocation7 + $0x120] ss:$16 sps:$4 sm:$0xff]   ;;  %v3704_v47 = vld [vmem:[#allocation7 + $0x8c] ss:$16 sps:$4 sm:$0xff]  }
  0x8c   :  { %v3736_v48 = vld [vmem:[#allocation7 + $0x144] ss:$16 sps:$4 sm:$0xff]   ;;  %v3741_v49 = vld [vmem:[#allocation7 + $0x140] ss:$16 sps:$4 sm:$0xff]   ;;  %v3702_v50 = vld [vmem:[#allocation7 + $0x88] ss:$16 sps:$4 sm:$0xff]  }
  0x8d   :  { %1980 = vmatpush1.bf16.msra.mxu0 %v3693_v21  ;;  %v3742_v51 = vld [vmem:[#allocation7 + $0x164] ss:$16 sps:$4 sm:$0xff]   ;;  %v3710_v52 = vld [vmem:[#allocation7 + $0xac] ss:$16 sps:$4 sm:$0xff]   ;;  %v3747_v53 = vld [vmem:[#allocation7 + $0x160] ss:$16 sps:$4 sm:$0xff]   ;;  %v145_v21 = vlaneseq }
  0x8e   :  { %1981 = vmatprep.subr.bf16.mxu0 %v3694_v24  ;;  %v3708_v54 = vld [vmem:[#allocation7 + $0xa8] ss:$16 sps:$4 sm:$0xff]   ;;  %v3748_v55 = vld [vmem:[#allocation7 + $0x184] ss:$16 sps:$4 sm:$0xff]   ;;  %v3716_v56 = vld [vmem:[#allocation7 + $0xcc] ss:$16 sps:$4 sm:$0xff]  }
  0x8f   :  { %3202 = vmatmul.mubr.msk.bf16.vlgmr.msra.gmra.mrb[4].mxu1 %vm225_vm0, %v134_v11  ;;  %v3753_v57 = vld [vmem:[#allocation7 + $0x180] ss:$16 sps:$4 sm:$0xff]   ;;  %v3714_v58 = vld [vmem:[#allocation7 + $0xc8] ss:$16 sps:$4 sm:$0xff]   ;;  %v3754_v59 = vld [vmem:[#allocation7 + $0x1a4] ss:$16 sps:$4 sm:$0xff]  }
  0x90   :  { %312 = vmatpush1.bf16.msra.mxu1 %v3197_v22  ;;  %343 = vmatprep.mubr.bf16.mxu1 %v4383_v0  ;;  %v3722_v60 = vld [vmem:[#allocation7 + $0xec] ss:$16 sps:$4 sm:$0xff]   ;;  %v3759_v61 = vld [vmem:[#allocation7 + $0x1a0] ss:$16 sps:$4 sm:$0xff]   ;;  %v3720_v62 = vld [vmem:[#allocation7 + $0xe8] ss:$16 sps:$4 sm:$0xff]  }
  0x91   :  { %352 = vmatprep.subr.bf16.mxu1 %v3200_v23  ;;  %1982 = vmatpush1.bf16.msra.mxu0 %v3699_v25  ;;  %v3728_v63 = vld [vmem:[#allocation7 + $0x10c] ss:$16 sps:$4 sm:$0xff]   ;;  %v3732_v2 = vld [vmem:[#allocation7 + $0x128] ss:$16 sps:$4 sm:$0xff]   ;;  %v3765_v14 = vld [vmem:[#allocation7 + $0x1c0] ss:$16 sps:$4 sm:$0xff]  }
  0x92   :  { %1983 = vmatprep.subr.bf16.mxu0 %v3700_v26  ;;  %v3734_v1 = vld [vmem:[#allocation7 + $0x12c] ss:$16 sps:$4 sm:$0xff]   ;;  %v3738_v4 = vld [vmem:[#allocation7 + $0x148] ss:$16 sps:$4 sm:$0xff]   ;;  %v3766_v15 = vld [vmem:[#allocation7 + $0x1e4] ss:$16 sps:$4 sm:$0xff]  }
  0x93   :  { %v3740_v3 = vld [vmem:[#allocation7 + $0x14c] ss:$16 sps:$4 sm:$0xff]   ;;  %v3744_v6 = vld [vmem:[#allocation7 + $0x168] ss:$16 sps:$4 sm:$0xff]   ;;  %v3771_v18 = vld [vmem:[#allocation7 + $0x1e0] ss:$16 sps:$4 sm:$0xff]  }
  0x94   :  { %v3746_v5 = vld [vmem:[#allocation7 + $0x16c] ss:$16 sps:$4 sm:$0xff]   ;;  %v3750_v8 = vld [vmem:[#allocation7 + $0x188] ss:$16 sps:$4 sm:$0xff]   ;;  %v3774_v19 = vld [vmem:[#allocation7 + $0x204] ss:$16 sps:$4 sm:$0xff]  }
  0x95   :  { %1984 = vmatpush1.bf16.msra.mxu0 %v3705_v27  ;;  %v3752_v7 = vld [vmem:[#allocation7 + $0x18c] ss:$16 sps:$4 sm:$0xff]   ;;  %v3756_v10 = vld [vmem:[#allocation7 + $0x1a8] ss:$16 sps:$4 sm:$0xff]   ;;  %v4569_v22 = vshrl.u32 %v145_v21, 7 }
  0x96   :  { %1985 = vmatprep.subr.bf16.mxu0 %v3706_v30  ;;  %v3758_v9 = vld [vmem:[#allocation7 + $0x1ac] ss:$16 sps:$4 sm:$0xff]   ;;  %v3762_v13 = vld [vmem:[#allocation7 + $0x1c8] ss:$16 sps:$4 sm:$0xff]  }
  0x97   :  { %3203 = vmatmul.mubr.msk.bf16.vlgmr.msra.gmra.mrb[8].mxu1 %vm225_vm0, %v134_v11  ;;  %v3764_v12 = vld [vmem:[#allocation7 + $0x1cc] ss:$16 sps:$4 sm:$0xff]   ;;  %v3768_v17 = vld [vmem:[#allocation7 + $0x1e8] ss:$16 sps:$4 sm:$0xff]   ;;  %v4572_v23 = vsub.s32 0, %v4569_v22  ;;  %v4577_v25 = vsub.s32 1, %v4569_v22 }
  0x98   :  { %353 = vmatpush1.bf16.msra.mxu1 %v3199_v28  ;;  %384 = vmatprep.mubr.bf16.mxu1 %v4383_v0  ;;  %v3726_v0 = vld [vmem:[#allocation7 + $0x108] ss:$16 sps:$4 sm:$0xff]   ;;  %v3770_v16 = vld [vmem:[#allocation7 + $0x1ec] ss:$16 sps:$4 sm:$0xff]  }
  0x99   :  { %2139 = vmatprep.subr.bf16.mxu1 %v3680_v29  ;;  %1986 = vmatpush1.bf16.msra.mxu0 %v3711_v31  ;;  %v3777_v20 = vld [vmem:[#allocation7 + $0x20c] ss:$16 sps:$4 sm:$0xff]  }
  0x9a   :  { %1987 = vmatprep.subr.bf16.mxu0 %v3712_v32  ;;  %v4574_v24 = vld [vmem:[#allocation5] sm:$0xff] }
  0x9b   :  { %v148_v26 = vrot.slane %v4574_v24, %v4572_v23  ;;  %v152_v27 = vrot.slane %v4574_v24, %v4577_v25  ;;  %v3825_v21 = vld [vmem:[#allocation7 + $0x30c] ss:$16 sps:$4 sm:$0xff]  }
  0x9d   :  { %1988 = vmatpush1.bf16.msra.mxu0 %v3717_v34 }
  0x9e   :  { %1989 = vmatprep.subr.bf16.mxu0 %v3718_v35 }
  0x9f   :  { %3204 = vmatmul.mubr.msk.bf16.vlgmr.msra.gmra.mrb[12].mxu1 %vm225_vm0, %v134_v11  ;;  %v3760_v11 = vld [vmem:[#allocation7 + $0x1c4] ss:$16 sps:$4 sm:$0xff]  }
  0xa0   :  { %2140 = vmatpush1.bf16.msra.mxu1 %v3678_v33  ;;  %v159_v33 = vsub.s32 3, %v4569_v22 }
  0xa1   :  { %2141 = vmatprep.subr.bf16.mxu1 %v3686_v36  ;;  %1990 = vmatpush1.bf16.msra.mxu0 %v3723_v38 }
  0xa2   :  { %1991 = vmatprep.subr.bf16.mxu0 %v3724_v39  ;;  %v160_v39 = vrot.slane %v4574_v24, %v159_v33 }
  0xa4   :  { %2142 = vmatpush1.bf16.msra.mxu1 %v3684_v37 }
  0xa5   :  { %2143 = vmatprep.subr.bf16.mxu1 %v3692_v40  ;;  %1992 = vmatpush1.bf16.msra.mxu0 %v3729_v42  ;;  %v3775_v42 = vld [vmem:[#allocation7 + $0x208] ss:$16 sps:$4 sm:$0xff]  }
  0xa6   :  { %1993 = vmatprep.subr.bf16.mxu0 %v3730_v43 }
  0xa8   :  { %2144 = vmatpush1.bf16.msra.mxu1 %v3690_v41  ;;  %v3772_v41 = vld [vmem:[#allocation7 + $0x200] ss:$16 sps:$4 sm:$0xff]  }
  0xa9   :  { %2145 = vmatprep.subr.bf16.mxu1 %v3698_v44  ;;  %1994 = vmatpush1.bf16.msra.mxu0 %v3735_v46  ;;  %v3783_v46 = vld [vmem:[#allocation7 + $0x22c] ss:$16 sps:$4 sm:$0xff]  }
  0xaa   :  { %1995 = vmatprep.subr.bf16.mxu0 %v3736_v48 }
  0xac   :  { %2146 = vmatpush1.bf16.msra.mxu1 %v3696_v45  ;;  %v3780_v45 = vld [vmem:[#allocation7 + $0x224] ss:$16 sps:$4 sm:$0xff]  }
  0xad   :  { %2147 = vmatprep.subr.bf16.mxu1 %v3704_v47  ;;  %1996 = vmatpush1.bf16.msra.mxu0 %v3741_v49 }
  0xae   :  { %1997 = vmatprep.subr.bf16.mxu0 %v3742_v51  ;;  %v3778_v51 = vld [vmem:[#allocation7 + $0x220] ss:$16 sps:$4 sm:$0xff]  }
  0xb0   :  { %2148 = vmatpush1.bf16.msra.mxu1 %v3702_v50 }
  0xb1   :  { %2149 = vmatprep.subr.bf16.mxu1 %v3710_v52  ;;  %1998 = vmatpush1.bf16.msra.mxu0 %v3747_v53  ;;  %v3781_v52 = vld [vmem:[#allocation7 + $0x228] ss:$16 sps:$4 sm:$0xff]  }
  0xb2   :  { %1999 = vmatprep.subr.bf16.mxu0 %v3748_v55  ;;  %v3789_v55 = vld [vmem:[#allocation7 + $0x24c] ss:$16 sps:$4 sm:$0xff]  }
  0xb4   :  { %2150 = vmatpush1.bf16.msra.mxu1 %v3708_v54  ;;  %v3786_v54 = vld [vmem:[#allocation7 + $0x244] ss:$16 sps:$4 sm:$0xff]  }
  0xb5   :  { %2151 = vmatprep.subr.bf16.mxu1 %v3716_v56  ;;  %2000 = vmatpush1.bf16.msra.mxu0 %v3753_v57  ;;  %v3784_v57 = vld [vmem:[#allocation7 + $0x240] ss:$16 sps:$4 sm:$0xff]  }
  0xb6   :  { %2001 = vmatprep.subr.bf16.mxu0 %v3754_v59 }
  0xb8   :  { %2152 = vmatpush1.bf16.msra.mxu1 %v3714_v58  ;;  %v3787_v58 = vld [vmem:[#allocation7 + $0x248] ss:$16 sps:$4 sm:$0xff]  }
  0xb9   :  { %2153 = vmatprep.subr.bf16.mxu1 %v3722_v60  ;;  %2002 = vmatpush1.bf16.msra.mxu0 %v3759_v61  ;;  %v3792_v61 = vld [vmem:[#allocation7 + $0x264] ss:$16 sps:$4 sm:$0xff]  }
  0xba   :  { %2003 = vmatprep.subr.bf16.mxu0 %v3760_v11  ;;  %v3805_v11 = vld [vmem:[#allocation7 + $0x2a8] ss:$16 sps:$4 sm:$0xff]  }
  0xbc   :  { %2154 = vmatpush1.bf16.msra.mxu1 %v3720_v62  ;;  %v3795_v62 = vld [vmem:[#allocation7 + $0x26c] ss:$16 sps:$4 sm:$0xff]  }
  0xbd   :  { %2155 = vmatprep.subr.bf16.mxu1 %v3728_v63  ;;  %2004 = vmatpush1.bf16.msra.mxu0 %v3765_v14  ;;  %v3808_v14 = vld [vmem:[#allocation7 + $0x2c0] ss:$16 sps:$4 sm:$0xff]  }
  0xbe   :  { %2005 = vmatprep.subr.bf16.mxu0 %v3766_v15  ;;  %v3811_v15 = vld [vmem:[#allocation7 + $0x2c8] ss:$16 sps:$4 sm:$0xff]  }
  0xc0   :  { %2156 = vmatpush1.bf16.msra.mxu1 %v3726_v0 }
  0xc1   :  { %2157 = vmatprep.subr.bf16.mxu1 %v3734_v1  ;;  %2006 = vmatpush1.bf16.msra.mxu0 %v3771_v18  ;;  %v3814_v18 = vld [vmem:[#allocation7 + $0x2e0] ss:$16 sps:$4 sm:$0xff]  }
  0xc2   :  { %2016 = vmatprep.subr.bf16.mxu0 %v3774_v19  ;;  %v3817_v19 = vld [vmem:[#allocation7 + $0x2e8] ss:$16 sps:$4 sm:$0xff]  }
  0xc4   :  { %2158 = vmatpush1.bf16.msra.mxu1 %v3732_v2  ;;  %v3790_v2 = vld [vmem:[#allocation7 + $0x260] ss:$16 sps:$4 sm:$0xff]  }
  0xc5   :  { %2159 = vmatprep.subr.bf16.mxu1 %v3740_v3  ;;  %v3793_v3 = vld [vmem:[#allocation7 + $0x268] ss:$16 sps:$4 sm:$0xff]  }
  0xc8   :  { %2160 = vmatpush1.bf16.msra.mxu1 %v3738_v4  ;;  %v3798_v4 = vld [vmem:[#allocation7 + $0x284] ss:$16 sps:$4 sm:$0xff]  }
  0xc9   :  { %2161 = vmatprep.subr.bf16.mxu1 %v3746_v5  ;;  %v3801_v5 = vld [vmem:[#allocation7 + $0x28c] ss:$16 sps:$4 sm:$0xff]  }
  0xcc   :  { %2162 = vmatpush1.bf16.msra.mxu1 %v3744_v6  ;;  %v3796_v6 = vld [vmem:[#allocation7 + $0x280] ss:$16 sps:$4 sm:$0xff]  }
  0xcd   :  { %2163 = vmatprep.subr.bf16.mxu1 %v3752_v7  ;;  %v3799_v7 = vld [vmem:[#allocation7 + $0x288] ss:$16 sps:$4 sm:$0xff]  }
  0xd0   :  { %2164 = vmatpush1.bf16.msra.mxu1 %v3750_v8  ;;  %v3804_v8 = vld [vmem:[#allocation7 + $0x2a4] ss:$16 sps:$4 sm:$0xff]  }
  0xd1   :  { %2165 = vmatprep.subr.bf16.mxu1 %v3758_v9  ;;  %v3807_v9 = vld [vmem:[#allocation7 + $0x2ac] ss:$16 sps:$4 sm:$0xff]  }
  0xd4   :  { %2166 = vmatpush1.bf16.msra.mxu1 %v3756_v10  ;;  %v3802_v10 = vld [vmem:[#allocation7 + $0x2a0] ss:$16 sps:$4 sm:$0xff]  }
  0xd5   :  { %2167 = vmatprep.subr.bf16.mxu1 %v3764_v12  ;;  %v3810_v12 = vld [vmem:[#allocation7 + $0x2c4] ss:$16 sps:$4 sm:$0xff]  }
  0xd8   :  { %2168 = vmatpush1.bf16.msra.mxu1 %v3762_v13  ;;  %v3813_v13 = vld [vmem:[#allocation7 + $0x2cc] ss:$16 sps:$4 sm:$0xff]  }
  0xd9   :  { %2169 = vmatprep.subr.bf16.mxu1 %v3770_v16  ;;  %v3816_v16 = vld [vmem:[#allocation7 + $0x2e4] ss:$16 sps:$4 sm:$0xff]  }
  0xdc   :  { %2170 = vmatpush1.bf16.msra.mxu1 %v3768_v17  ;;  %v3819_v17 = vld [vmem:[#allocation7 + $0x2ec] ss:$16 sps:$4 sm:$0xff]  }
  0xdd   :  { %2180 = vmatprep.subr.bf16.mxu1 %v3777_v20  ;;  %v3822_v20 = vld [vmem:[#allocation7 + $0x304] ss:$16 sps:$4 sm:$0xff]  }
 0x15a   :  { %v263_v28 = vpop.f32.mrb[0].mxu1 }
 0x15b   :  { %v264_v29 = vadd.f32 %v263_v28, %v148_v26  ;;  %v265_v30 = vpop.f32.mrb[1].mxu1  ;;  %v3820_v26 = vld [vmem:[#allocation7 + $0x300] ss:$16 sps:$4 sm:$0xff]   ;;  %v3828_v28 = vld [vmem:[#allocation7 + $0x324] ss:$16 sps:$4 sm:$0xff]  }
 0x15c   :  { %v266_v31 = vadd.f32 %v265_v30, %v152_v27  ;;  %v267_v32 = vpop.f32.mrb[2].mxu1  ;;  %v3823_v27 = vld [vmem:[#allocation7 + $0x308] ss:$16 sps:$4 sm:$0xff]   ;;  %v3826_v30 = vld [vmem:[#allocation7 + $0x320] ss:$16 sps:$4 sm:$0xff]  }
 0x15d   :  { %v393_v34 = vmul.f32 0.01, %v264_v29  ;;  %v268_v35 = vpop.f32.mrb[3].mxu1  ;;  %v3834_v32 = vld [vmem:[#allocation7 + $0x344] ss:$16 sps:$4 sm:$0xff]  }
 0x15e   :  { %v394_v36 = vmul.f32 0.01, %v266_v31  ;;  %v3832_v35 = vld [vmem:[#allocation7 + $0x340] ss:$16 sps:$4 sm:$0xff]  }
 0x15f   :  { %v401_v37 = vmax.f32 %v264_v29, %v393_v34  ;;  %v3831_v29 = vld [vmem:[#allocation7 + $0x32c] ss:$16 sps:$4 sm:$0xff]  }
 0x160   :  { %v402_v38 = vmax.f32 %v266_v31, %v394_v36  ;;  %v3829_v31 = vld [vmem:[#allocation7 + $0x328] ss:$16 sps:$4 sm:$0xff]   ;;  %v3837_v34 = vld [vmem:[#allocation7 + $0x34c] ss:$16 sps:$4 sm:$0xff]  }
 0x161   :  { %v409_v44 = vpack.c.bf16 %v401_v37, %v401_v37  ;;  %v3835_v36 = vld [vmem:[#allocation7 + $0x348] ss:$16 sps:$4 sm:$0xff]   ;;  %v3840_v37 = vld [vmem:[#allocation7 + $0x364] ss:$16 sps:$4 sm:$0xff]  }
 0x162   :  { %v410_v40 = vpack.c.bf16 %v402_v38, %v402_v38  ;;  %v4587_v43 = vpop.f32.mrb[4].mxu1  ;;  %v3843_v38 = vld [vmem:[#allocation7 + $0x36c] ss:$16 sps:$4 sm:$0xff]  }
 0x163   :  { %v306_v47 = vpop.f32.mrb[5].mxu1 }
 0x164   :  { %2007 = vmatprep.mubr.bf16.mxu0 %v410_v40  ;;  %2171 = vmatprep.mubr.bf16.mxu1 %v410_v40  ;;  %v307_v48 = vadd.f32 %v306_v47, %v160_v39  ;;  %v308_v49 = vpop.f32.mrb[6].mxu1  ;;  %v3838_v39 = vld [vmem:[#allocation7 + $0x360] ss:$16 sps:$4 sm:$0xff]   ;;  %v3841_v40 = vld [vmem:[#allocation7 + $0x368] ss:$16 sps:$4 sm:$0xff]  }
 0x165   :  { %2008 = vmatmul.mubr.bf16.vlgmr.msra.gmra.mrb[0].mxu0 %v409_v44  ;;  %2172 = vmatmul.mubr.bf16.vlgmr.msra.gmra.mrb[16].mxu1 %v409_v44  ;;  %v309_v50 = vpop.f32.mrb[7].mxu1  ;;  %v155_v44 = vsub.s32 2, %v4569_v22  ;;  %v3847_v47 = vld [vmem:[#allocation7 + $0x388] ss:$16 sps:$4 sm:$0xff]   ;;  %v3852_v49 = vld [vmem:[#allocation7 + $0x3a4] ss:$16 sps:$4 sm:$0xff]  }
 0x166   :  { %2017 = vmatpush1.bf16.msra.mxu0 %v3772_v41  ;;  %2181 = vmatpush1.bf16.msra.mxu1 %v3775_v42  ;;  %v396_v53 = vmul.f32 0.01, %v307_v48  ;;  %v3846_v41 = vld [vmem:[#allocation7 + $0x384] ss:$16 sps:$4 sm:$0xff]   ;;  %v3849_v42 = vld [vmem:[#allocation7 + $0x38c] ss:$16 sps:$4 sm:$0xff]  }
 0x167   :  { %2018 = vmatprep.subr.bf16.mxu0 %v3780_v45  ;;  %2182 = vmatprep.subr.bf16.mxu1 %v3783_v46  ;;  %v167_v45 = vsub.s32 5, %v4569_v22  ;;  %v3844_v46 = vld [vmem:[#allocation7 + $0x380] ss:$16 sps:$4 sm:$0xff]   ;;  %v3855_v50 = vld [vmem:[#allocation7 + $0x3ac] ss:$16 sps:$4 sm:$0xff]  }
 0x168   :  { %v404_v56 = vmax.f32 %v307_v48, %v396_v53  ;;  %v156_v48 = vrot.slane %v4574_v24, %v155_v44  ;;  %v3853_v53 = vld [vmem:[#allocation7 + $0x3a8] ss:$16 sps:$4 sm:$0xff]  }
 0x16a   :  { %2019 = vmatpush1.bf16.msra.mxu0 %v3778_v51  ;;  %2183 = vmatpush1.bf16.msra.mxu1 %v3781_v52  ;;  %v412_v59 = vpack.c.bf16 %v404_v56, %v404_v56  ;;  %v4589_v60 = vpop.f32.mrb[8].mxu1  ;;  %v168_v51 = vrot.slane %v4574_v24, %v167_v45  ;;  %v3850_v52 = vld [vmem:[#allocation7 + $0x3a0] ss:$16 sps:$4 sm:$0xff]   ;;  %v3858_v56 = vld [vmem:[#allocation7 + $0x3c4] ss:$16 sps:$4 sm:$0xff]  }
 0x16b   :  { %2020 = vmatprep.subr.bf16.mxu0 %v3786_v54  ;;  %2184 = vmatprep.subr.bf16.mxu1 %v3789_v55  ;;  %v4591_v63 = vpop.f32.mrb[9].mxu1  ;;  %v305_v55 = vadd.f32 %v4587_v43, %v156_v48  ;;  %v3912_v45 = vld [vmem:[#allocation7 + $0x4e4] ss:$16 sps:$4 sm:$0xff]   ;;  %v3913_v48 = vld [vmem:[#allocation7 + $0x4e8] ss:$16 sps:$4 sm:$0xff]  }
 0x16c   :  { %2048 = vmatprep.mubr.bf16.mxu0 %v412_v59  ;;  %2212 = vmatprep.mubr.bf16.mxu1 %v412_v59  ;;  %v349_v0 = vpop.f32.mrb[10].mxu1  ;;  %v348_v59 = vadd.f32 %v4591_v63, %v168_v51  ;;  %v3870_v63 = vld [vmem:[#allocation7 + $0x404] ss:$16 sps:$4 sm:$0xff]   ;;  %v3916_v51 = vld [vmem:[#allocation7 + $0x500] ss:$16 sps:$4 sm:$0xff]  }
 0x16d   :  { %v350_v1 = vpop.f32.mrb[11].mxu1  ;;  %v3856_v0 = vld [vmem:[#allocation7 + $0x3c0] ss:$16 sps:$4 sm:$0xff]  }
 0x16e   :  { %2021 = vmatpush1.bf16.msra.mxu0 %v3784_v57  ;;  %2185 = vmatpush1.bf16.msra.mxu1 %v3787_v58  ;;  %v3861_v57 = vld [vmem:[#allocation7 + $0x3cc] ss:$16 sps:$4 sm:$0xff]   ;;  %v3859_v1 = vld [vmem:[#allocation7 + $0x3c8] ss:$16 sps:$4 sm:$0xff]   ;;  %v398_v43 = vmul.f32 0.01, %v348_v59 }
 0x16f   :  { %2022 = vmatprep.subr.bf16.mxu0 %v3792_v61  ;;  %2186 = vmatprep.subr.bf16.mxu1 %v3795_v62 }
 0x172   :  { %2023 = vmatpush1.bf16.msra.mxu0 %v3790_v2  ;;  %2187 = vmatpush1.bf16.msra.mxu1 %v3793_v3  ;;  %v4599_v54 = vpop.f32.mrb[12].mxu1  ;;  %v395_v2 = vmul.f32 0.01, %v305_v55  ;;  %v3864_v3 = vld [vmem:[#allocation7 + $0x3e4] ss:$16 sps:$4 sm:$0xff]  }
 0x173   :  { %2024 = vmatprep.subr.bf16.mxu0 %v3798_v4  ;;  %2188 = vmatprep.subr.bf16.mxu1 %v3801_v5  ;;  %v4602_v58 = vpop.f32.mrb[13].mxu1  ;;  %v3867_v4 = vld [vmem:[#allocation7 + $0x3ec] ss:$16 sps:$4 sm:$0xff]   ;;  %v3862_v5 = vld [vmem:[#allocation7 + $0x3e0] ss:$16 sps:$4 sm:$0xff]  }
 0x174   :  { %v390_v61 = vpop.f32.mrb[14].mxu1 }
 0x175   :  { %v391_v62 = vpop.f32.mrb[15].mxu1  ;;  %v3933_v61 = vld [vmem:[#allocation7 + $0x54c] ss:$16 sps:$4 sm:$0xff]  }
 0x176   :  { %2025 = vmatpush1.bf16.msra.mxu0 %v3796_v6  ;;  %2189 = vmatpush1.bf16.msra.mxu1 %v3799_v7  ;;  %v3865_v6 = vld [vmem:[#allocation7 + $0x3e8] ss:$16 sps:$4 sm:$0xff]   ;;  %v403_v7 = vmax.f32 %v305_v55, %v395_v2  ;;  %v3927_v55 = vld [vmem:[#allocation7 + $0x52c] ss:$16 sps:$4 sm:$0xff]   ;;  %v3928_v62 = vld [vmem:[#allocation7 + $0x540] ss:$16 sps:$4 sm:$0xff]  }
 0x177   :  { %2026 = vmatprep.subr.bf16.mxu0 %v3804_v8  ;;  %2190 = vmatprep.subr.bf16.mxu1 %v3807_v9  ;;  %v3873_v8 = vld [vmem:[#allocation7 + $0x40c] ss:$16 sps:$4 sm:$0xff]   ;;  %v406_v9 = vmax.f32 %v348_v59, %v398_v43  ;;  %v3930_v59 = vld [vmem:[#allocation7 + $0x544] ss:$16 sps:$4 sm:$0xff]  }
 0x178   :  { %v3939_v2 = vld [vmem:[#allocation7 + $0x56c] ss:$16 sps:$4 sm:$0xff]   ;;  %v3942_v43 = vld [vmem:[#allocation7 + $0x584] ss:$16 sps:$4 sm:$0xff]  }
 0x17a   :  { %2027 = vmatpush1.bf16.msra.mxu0 %v3802_v10  ;;  %2191 = vmatpush1.bf16.msra.mxu1 %v3805_v11  ;;  %v3868_v10 = vld [vmem:[#allocation7 + $0x400] ss:$16 sps:$4 sm:$0xff]   ;;  %v3871_v11 = vld [vmem:[#allocation7 + $0x408] ss:$16 sps:$4 sm:$0xff]  }
 0x17b   :  { %2028 = vmatprep.subr.bf16.mxu0 %v3810_v12  ;;  %2192 = vmatprep.subr.bf16.mxu1 %v3813_v13  ;;  %v411_v12 = vpack.c.bf16 %v403_v7, %v403_v7  ;;  %v3876_v13 = vld [vmem:[#allocation7 + $0x424] ss:$16 sps:$4 sm:$0xff]   ;;  %v175_v7 = vsub.s32 7, %v4569_v22 }
 0x17e   :  { %2029 = vmatpush1.bf16.msra.mxu0 %v3808_v14  ;;  %2193 = vmatpush1.bf16.msra.mxu1 %v3811_v15  ;;  %v3879_v14 = vld [vmem:[#allocation7 + $0x42c] ss:$16 sps:$4 sm:$0xff]   ;;  %v414_v15 = vpack.c.bf16 %v406_v9, %v406_v9 }
 0x17f   :  { %2030 = vmatprep.subr.bf16.mxu0 %v3816_v16  ;;  %2194 = vmatprep.subr.bf16.mxu1 %v3819_v17  ;;  %v3874_v16 = vld [vmem:[#allocation7 + $0x420] ss:$16 sps:$4 sm:$0xff]   ;;  %v3877_v17 = vld [vmem:[#allocation7 + $0x428] ss:$16 sps:$4 sm:$0xff]  }
 0x182   :  { %2031 = vmatpush1.bf16.msra.mxu0 %v3814_v18  ;;  %2195 = vmatpush1.bf16.msra.mxu1 %v3817_v19  ;;  %v3882_v18 = vld [vmem:[#allocation7 + $0x444] ss:$16 sps:$4 sm:$0xff]   ;;  %v3885_v19 = vld [vmem:[#allocation7 + $0x44c] ss:$16 sps:$4 sm:$0xff]  }
 0x183   :  { %2032 = vmatprep.subr.bf16.mxu0 %v3822_v20  ;;  %2196 = vmatprep.subr.bf16.mxu1 %v3825_v21  ;;  %v3880_v20 = vld [vmem:[#allocation7 + $0x440] ss:$16 sps:$4 sm:$0xff]   ;;  %v3883_v21 = vld [vmem:[#allocation7 + $0x448] ss:$16 sps:$4 sm:$0xff]  }
 0x186   :  { %2033 = vmatpush1.bf16.msra.mxu0 %v3820_v26  ;;  %2197 = vmatpush1.bf16.msra.mxu1 %v3823_v27  ;;  %v3888_v26 = vld [vmem:[#allocation7 + $0x464] ss:$16 sps:$4 sm:$0xff]   ;;  %v3891_v27 = vld [vmem:[#allocation7 + $0x46c] ss:$16 sps:$4 sm:$0xff]  }
 0x187   :  { %2034 = vmatprep.subr.bf16.mxu0 %v3828_v28  ;;  %2198 = vmatprep.subr.bf16.mxu1 %v3831_v29  ;;  %v3886_v28 = vld [vmem:[#allocation7 + $0x460] ss:$16 sps:$4 sm:$0xff]   ;;  %v3889_v29 = vld [vmem:[#allocation7 + $0x468] ss:$16 sps:$4 sm:$0xff]  }
 0x18a   :  { %2035 = vmatpush1.bf16.msra.mxu0 %v3826_v30  ;;  %2199 = vmatpush1.bf16.msra.mxu1 %v3829_v31  ;;  %v3894_v30 = vld [vmem:[#allocation7 + $0x484] ss:$16 sps:$4 sm:$0xff]   ;;  %v3897_v31 = vld [vmem:[#allocation7 + $0x48c] ss:$16 sps:$4 sm:$0xff]  }
 0x18b   :  { %2036 = vmatprep.subr.bf16.mxu0 %v3834_v32  ;;  %2200 = vmatprep.subr.bf16.mxu1 %v3837_v34  ;;  %v3892_v32 = vld [vmem:[#allocation7 + $0x480] ss:$16 sps:$4 sm:$0xff]   ;;  %v3895_v34 = vld [vmem:[#allocation7 + $0x488] ss:$16 sps:$4 sm:$0xff]  }
 0x18e   :  { %2037 = vmatpush1.bf16.msra.mxu0 %v3832_v35  ;;  %2201 = vmatpush1.bf16.msra.mxu1 %v3835_v36  ;;  %v3900_v35 = vld [vmem:[#allocation7 + $0x4a4] ss:$16 sps:$4 sm:$0xff]   ;;  %v3903_v36 = vld [vmem:[#allocation7 + $0x4ac] ss:$16 sps:$4 sm:$0xff]  }
 0x18f   :  { %2038 = vmatprep.subr.bf16.mxu0 %v3840_v37  ;;  %2202 = vmatprep.subr.bf16.mxu1 %v3843_v38  ;;  %v3898_v37 = vld [vmem:[#allocation7 + $0x4a0] ss:$16 sps:$4 sm:$0xff]   ;;  %v3901_v38 = vld [vmem:[#allocation7 + $0x4a8] ss:$16 sps:$4 sm:$0xff]  }
 0x192   :  { %2039 = vmatpush1.bf16.msra.mxu0 %v3838_v39  ;;  %2203 = vmatpush1.bf16.msra.mxu1 %v3841_v40  ;;  %v3906_v39 = vld [vmem:[#allocation7 + $0x4c4] ss:$16 sps:$4 sm:$0xff]   ;;  %v3909_v40 = vld [vmem:[#allocation7 + $0x4cc] ss:$16 sps:$4 sm:$0xff]  }
 0x193   :  { %2040 = vmatprep.subr.bf16.mxu0 %v3846_v41  ;;  %2204 = vmatprep.subr.bf16.mxu1 %v3849_v42  ;;  %v3904_v41 = vld [vmem:[#allocation7 + $0x4c0] ss:$16 sps:$4 sm:$0xff]   ;;  %v3907_v42 = vld [vmem:[#allocation7 + $0x4c8] ss:$16 sps:$4 sm:$0xff]  }
 0x196   :  { %2041 = vmatpush1.bf16.msra.mxu0 %v3844_v46  ;;  %2205 = vmatpush1.bf16.msra.mxu1 %v3847_v47  ;;  %v3915_v46 = vld [vmem:[#allocation7 + $0x4ec] ss:$16 sps:$4 sm:$0xff]   ;;  %v3910_v47 = vld [vmem:[#allocation7 + $0x4e0] ss:$16 sps:$4 sm:$0xff]  }
 0x197   :  { %2042 = vmatprep.subr.bf16.mxu0 %v3852_v49  ;;  %2206 = vmatprep.subr.bf16.mxu1 %v3855_v50  ;;  %v3918_v49 = vld [vmem:[#allocation7 + $0x504] ss:$16 sps:$4 sm:$0xff]   ;;  %v3921_v50 = vld [vmem:[#allocation7 + $0x50c] ss:$16 sps:$4 sm:$0xff]  }
 0x19a   :  { %2043 = vmatpush1.bf16.msra.mxu0 %v3850_v52  ;;  %2207 = vmatpush1.bf16.msra.mxu1 %v3853_v53  ;;  %v3919_v52 = vld [vmem:[#allocation7 + $0x508] ss:$16 sps:$4 sm:$0xff]   ;;  %v3924_v53 = vld [vmem:[#allocation7 + $0x524] ss:$16 sps:$4 sm:$0xff]  }
 0x19b   :  { %2044 = vmatprep.subr.bf16.mxu0 %v3858_v56  ;;  %2208 = vmatprep.subr.bf16.mxu1 %v3861_v57  ;;  %v3922_v56 = vld [vmem:[#allocation7 + $0x520] ss:$16 sps:$4 sm:$0xff]   ;;  %v3925_v57 = vld [vmem:[#allocation7 + $0x528] ss:$16 sps:$4 sm:$0xff]  }
 0x19e   :  { %2045 = vmatpush1.bf16.msra.mxu0 %v3856_v0  ;;  %2209 = vmatpush1.bf16.msra.mxu1 %v3859_v1  ;;  %v3931_v0 = vld [vmem:[#allocation7 + $0x548] ss:$16 sps:$4 sm:$0xff]   ;;  %v3936_v1 = vld [vmem:[#allocation7 + $0x564] ss:$16 sps:$4 sm:$0xff]  }
 0x19f   :  { %2046 = vmatprep.subr.bf16.mxu0 %v3864_v3  ;;  %2210 = vmatprep.subr.bf16.mxu1 %v3867_v4  ;;  %v3934_v3 = vld [vmem:[#allocation7 + $0x560] ss:$16 sps:$4 sm:$0xff]   ;;  %v3937_v4 = vld [vmem:[#allocation7 + $0x568] ss:$16 sps:$4 sm:$0xff]  }
 0x1a2   :  { %2047 = vmatpush1.bf16.msra.mxu0 %v3862_v5  ;;  %2211 = vmatpush1.bf16.msra.mxu1 %v3865_v6  ;;  %v3945_v5 = vld [vmem:[#allocation7 + $0x58c] ss:$16 sps:$4 sm:$0xff]   ;;  %v163_v6 = vsub.s32 4, %v4569_v22 }
 0x1a3   :  { %2057 = vmatprep.subr.bf16.mxu0 %v3870_v63  ;;  %2221 = vmatprep.subr.bf16.mxu1 %v3873_v8  ;;  %v3940_v63 = vld [vmem:[#allocation7 + $0x580] ss:$16 sps:$4 sm:$0xff]   ;;  %v3943_v8 = vld [vmem:[#allocation7 + $0x588] ss:$16 sps:$4 sm:$0xff]  }
 0x1a4   :  { %v164_v9 = vrot.slane %v4574_v24, %v163_v6  ;;  %v4009_v6 = vld [vmem:[#allocation7 + $0x6e8] ss:$16 sps:$4 sm:$0xff]  }
 0x1a5   :  { %2049 = vmatmul.mubr.bf16.vlgmr.msra.gmra.mrb[0].mxu0 %v411_v12  ;;  %2213 = vmatmul.mubr.bf16.vlgmr.msra.gmra.mrb[16].mxu1 %v411_v12  ;;  %v176_v12 = vrot.slane %v4574_v24, %v175_v7  ;;  %v4014_v7 = vld [vmem:[#allocation7 + $0x704] ss:$16 sps:$4 sm:$0xff]  }
 0x1a6   :  { %2058 = vmatpush1.bf16.msra.mxu0 %v3868_v10  ;;  %2222 = vmatpush1.bf16.msra.mxu1 %v3871_v11  ;;  %v3948_v10 = vld [vmem:[#allocation7 + $0x5a4] ss:$16 sps:$4 sm:$0xff]   ;;  %v3951_v11 = vld [vmem:[#allocation7 + $0x5ac] ss:$16 sps:$4 sm:$0xff]  }
 0x1a7   :  { %2059 = vmatprep.subr.bf16.mxu0 %v3876_v13  ;;  %2223 = vmatprep.subr.bf16.mxu1 %v3879_v14  ;;  %v3946_v13 = vld [vmem:[#allocation7 + $0x5a0] ss:$16 sps:$4 sm:$0xff]   ;;  %v3949_v14 = vld [vmem:[#allocation7 + $0x5a8] ss:$16 sps:$4 sm:$0xff]  }
 0x1a8   :  { %2089 = vmatprep.mubr.bf16.mxu0 %v414_v15  ;;  %2253 = vmatprep.mubr.bf16.mxu1 %v414_v15  ;;  %v346_v15 = vadd.f32 %v4589_v60, %v164_v9  ;;  %v3961_v60 = vld [vmem:[#allocation7 + $0x5e8] ss:$16 sps:$4 sm:$0xff]  }
 0x1a9   :  { %v4015_v9 = vld [vmem:[#allocation7 + $0x708] ss:$16 sps:$4 sm:$0xff]  }
 0x1aa   :  { %2060 = vmatpush1.bf16.msra.mxu0 %v3874_v16  ;;  %2224 = vmatpush1.bf16.msra.mxu1 %v3877_v17  ;;  %v3954_v16 = vld [vmem:[#allocation7 + $0x5c4] ss:$16 sps:$4 sm:$0xff]   ;;  %v3957_v17 = vld [vmem:[#allocation7 + $0x5cc] ss:$16 sps:$4 sm:$0xff]  }
 0x1ab   :  { %2061 = vmatprep.subr.bf16.mxu0 %v3882_v18  ;;  %2225 = vmatprep.subr.bf16.mxu1 %v3885_v19  ;;  %v389_v18 = vadd.f32 %v4602_v58, %v176_v12  ;;  %v3952_v19 = vld [vmem:[#allocation7 + $0x5c0] ss:$16 sps:$4 sm:$0xff]  }
 0x1ac   :  { %v4018_v12 = vld [vmem:[#allocation7 + $0x720] ss:$16 sps:$4 sm:$0xff]  }
 0x1ae   :  { %2062 = vmatpush1.bf16.msra.mxu0 %v3880_v20  ;;  %2226 = vmatpush1.bf16.msra.mxu1 %v3883_v21  ;;  %v3955_v20 = vld [vmem:[#allocation7 + $0x5c8] ss:$16 sps:$4 sm:$0xff]   ;;  %v397_v21 = vmul.f32 0.01, %v346_v15 }
 0x1af   :  { %2063 = vmatprep.subr.bf16.mxu0 %v3888_v26  ;;  %2227 = vmatprep.subr.bf16.mxu1 %v3891_v27  ;;  %v3960_v26 = vld [vmem:[#allocation7 + $0x5e4] ss:$16 sps:$4 sm:$0xff]   ;;  %v3963_v27 = vld [vmem:[#allocation7 + $0x5ec] ss:$16 sps:$4 sm:$0xff]  }
 0x1b2   :  { %2064 = vmatpush1.bf16.msra.mxu0 %v3886_v28  ;;  %2228 = vmatpush1.bf16.msra.mxu1 %v3889_v29  ;;  %v400_v28 = vmul.f32 0.01, %v389_v18  ;;  %v3958_v29 = vld [vmem:[#allocation7 + $0x5e0] ss:$16 sps:$4 sm:$0xff]  }
 0x1b3   :  { %2065 = vmatprep.subr.bf16.mxu0 %v3894_v30  ;;  %2229 = vmatprep.subr.bf16.mxu1 %v3897_v31  ;;  %v405_v30 = vmax.f32 %v346_v15, %v397_v21  ;;  %v3966_v31 = vld [vmem:[#allocation7 + $0x604] ss:$16 sps:$4 sm:$0xff]   ;;  %v4029_v15 = vld [vmem:[#allocation7 + $0x74c] ss:$16 sps:$4 sm:$0xff]   ;;  %v4033_v21 = vld [vmem:[#allocation7 + $0x768] ss:$16 sps:$4 sm:$0xff]  }
 0x1b4   :  { %v408_v58 = vmax.f32 %v389_v18, %v400_v28  ;;  %v4032_v18 = vld [vmem:[#allocation7 + $0x764] ss:$16 sps:$4 sm:$0xff]   ;;  %v171_v28 = vsub.s32 6, %v4569_v22 }
 0x1b6   :  { %2066 = vmatpush1.bf16.msra.mxu0 %v3892_v32  ;;  %2230 = vmatpush1.bf16.msra.mxu1 %v3895_v34  ;;  %v3969_v32 = vld [vmem:[#allocation7 + $0x60c] ss:$16 sps:$4 sm:$0xff]   ;;  %v3964_v34 = vld [vmem:[#allocation7 + $0x600] ss:$16 sps:$4 sm:$0xff]  }
 0x1b7   :  { %2067 = vmatprep.subr.bf16.mxu0 %v3900_v35  ;;  %2231 = vmatprep.subr.bf16.mxu1 %v3903_v36  ;;  %v3967_v35 = vld [vmem:[#allocation7 + $0x608] ss:$16 sps:$4 sm:$0xff]   ;;  %v413_v36 = vpack.c.bf16 %v405_v30, %v405_v30  ;;  %v172_v30 = vrot.slane %v4574_v24, %v171_v28  ;;  %v4056_v24 = vld [vmem:[#allocation7 + $0x7e4] ss:$16 sps:$4 sm:$0xff]   ;;  %v4162_v28 = vld [vmem:[#allocation11 + $0x58] sm:$0xff]  }
 0x1ba   :  { %2068 = vmatpush1.bf16.msra.mxu0 %v3898_v37  ;;  %2232 = vmatpush1.bf16.msra.mxu1 %v3901_v38  ;;  %v3972_v37 = vld [vmem:[#allocation7 + $0x624] ss:$16 sps:$4 sm:$0xff]   ;;  %v3975_v38 = vld [vmem:[#allocation7 + $0x62c] ss:$16 sps:$4 sm:$0xff]  }
 0x1bb   :  { %2069 = vmatprep.subr.bf16.mxu0 %v3906_v39  ;;  %2233 = vmatprep.subr.bf16.mxu1 %v3909_v40  ;;  %v416_v39 = vpack.c.bf16 %v408_v58, %v408_v58  ;;  %v3970_v40 = vld [vmem:[#allocation7 + $0x620] ss:$16 sps:$4 sm:$0xff]  }
 0x1bc   :  { %v4042_v58 = vld [vmem:[#allocation7 + $0x7a0] ss:$16 sps:$4 sm:$0xff]  }
 0x1be   :  { %2070 = vmatpush1.bf16.msra.mxu0 %v3904_v41  ;;  %2234 = vmatpush1.bf16.msra.mxu1 %v3907_v42  ;;  %v3973_v41 = vld [vmem:[#allocation7 + $0x628] ss:$16 sps:$4 sm:$0xff]   ;;  %v3978_v42 = vld [vmem:[#allocation7 + $0x644] ss:$16 sps:$4 sm:$0xff]  }
 0x1bf   :  { %2071 = vmatprep.subr.bf16.mxu0 %v3912_v45  ;;  %2235 = vmatprep.subr.bf16.mxu1 %v3915_v46  ;;  %v3981_v45 = vld [vmem:[#allocation7 + $0x64c] ss:$16 sps:$4 sm:$0xff]   ;;  %v3976_v46 = vld [vmem:[#allocation7 + $0x640] ss:$16 sps:$4 sm:$0xff]  }
 0x1c2   :  { %2072 = vmatpush1.bf16.msra.mxu0 %v3910_v47  ;;  %2236 = vmatpush1.bf16.msra.mxu1 %v3913_v48  ;;  %v3979_v47 = vld [vmem:[#allocation7 + $0x648] ss:$16 sps:$4 sm:$0xff]   ;;  %v3984_v48 = vld [vmem:[#allocation7 + $0x664] ss:$16 sps:$4 sm:$0xff]  }
 0x1c3   :  { %2073 = vmatprep.subr.bf16.mxu0 %v3918_v49  ;;  %2237 = vmatprep.subr.bf16.mxu1 %v3921_v50  ;;  %v3987_v49 = vld [vmem:[#allocation7 + $0x66c] ss:$16 sps:$4 sm:$0xff]   ;;  %v3982_v50 = vld [vmem:[#allocation7 + $0x660] ss:$16 sps:$4 sm:$0xff]  }
 0x1c6   :  { %2074 = vmatpush1.bf16.msra.mxu0 %v3916_v51  ;;  %2238 = vmatpush1.bf16.msra.mxu1 %v3919_v52  ;;  %v3985_v51 = vld [vmem:[#allocation7 + $0x668] ss:$16 sps:$4 sm:$0xff]   ;;  %v3990_v52 = vld [vmem:[#allocation7 + $0x684] ss:$16 sps:$4 sm:$0xff]  }
 0x1c7   :  { %2075 = vmatprep.subr.bf16.mxu0 %v3924_v53  ;;  %2239 = vmatprep.subr.bf16.mxu1 %v3927_v55  ;;  %v3993_v53 = vld [vmem:[#allocation7 + $0x68c] ss:$16 sps:$4 sm:$0xff]   ;;  %v3988_v55 = vld [vmem:[#allocation7 + $0x680] ss:$16 sps:$4 sm:$0xff]  }
 0x1ca   :  { %2076 = vmatpush1.bf16.msra.mxu0 %v3922_v56  ;;  %2240 = vmatpush1.bf16.msra.mxu1 %v3925_v57  ;;  %v3991_v56 = vld [vmem:[#allocation7 + $0x688] ss:$16 sps:$4 sm:$0xff]   ;;  %v3996_v57 = vld [vmem:[#allocation7 + $0x6a4] ss:$16 sps:$4 sm:$0xff]  }
 0x1cb   :  { %2077 = vmatprep.subr.bf16.mxu0 %v3930_v59  ;;  %2241 = vmatprep.subr.bf16.mxu1 %v3933_v61  ;;  %v3999_v59 = vld [vmem:[#allocation7 + $0x6ac] ss:$16 sps:$4 sm:$0xff]   ;;  %v3994_v61 = vld [vmem:[#allocation7 + $0x6a0] ss:$16 sps:$4 sm:$0xff]  }
 0x1ce   :  { %2078 = vmatpush1.bf16.msra.mxu0 %v3928_v62  ;;  %2242 = vmatpush1.bf16.msra.mxu1 %v3931_v0  ;;  %v3997_v62 = vld [vmem:[#allocation7 + $0x6a8] ss:$16 sps:$4 sm:$0xff]   ;;  %v4002_v0 = vld [vmem:[#allocation7 + $0x6c4] ss:$16 sps:$4 sm:$0xff]  }
 0x1cf   :  { %2079 = vmatprep.subr.bf16.mxu0 %v3936_v1  ;;  %2243 = vmatprep.subr.bf16.mxu1 %v3939_v2  ;;  %v4005_v1 = vld [vmem:[#allocation7 + $0x6cc] ss:$16 sps:$4 sm:$0xff]   ;;  %v4000_v2 = vld [vmem:[#allocation7 + $0x6c0] ss:$16 sps:$4 sm:$0xff]  }
 0x1d2   :  { %2080 = vmatpush1.bf16.msra.mxu0 %v3934_v3  ;;  %2244 = vmatpush1.bf16.msra.mxu1 %v3937_v4  ;;  %v4003_v3 = vld [vmem:[#allocation7 + $0x6c8] ss:$16 sps:$4 sm:$0xff]   ;;  %v4008_v4 = vld [vmem:[#allocation7 + $0x6e4] ss:$16 sps:$4 sm:$0xff]  }
 0x1d3   :  { %2081 = vmatprep.subr.bf16.mxu0 %v3942_v43  ;;  %2245 = vmatprep.subr.bf16.mxu1 %v3945_v5  ;;  %v4011_v43 = vld [vmem:[#allocation7 + $0x6ec] ss:$16 sps:$4 sm:$0xff]   ;;  %v4006_v5 = vld [vmem:[#allocation7 + $0x6e0] ss:$16 sps:$4 sm:$0xff]  }
 0x1d6   :  { %2082 = vmatpush1.bf16.msra.mxu0 %v3940_v63  ;;  %2246 = vmatpush1.bf16.msra.mxu1 %v3943_v8  ;;  %v4017_v63 = vld [vmem:[#allocation7 + $0x70c] ss:$16 sps:$4 sm:$0xff]   ;;  %v4012_v8 = vld [vmem:[#allocation7 + $0x700] ss:$16 sps:$4 sm:$0xff]  }
 0x1d7   :  { %2083 = vmatprep.subr.bf16.mxu0 %v3948_v10  ;;  %2247 = vmatprep.subr.bf16.mxu1 %v3951_v11  ;;  %v4020_v10 = vld [vmem:[#allocation7 + $0x724] ss:$16 sps:$4 sm:$0xff]   ;;  %v4023_v11 = vld [vmem:[#allocation7 + $0x72c] ss:$16 sps:$4 sm:$0xff]  }
 0x1da   :  { %2084 = vmatpush1.bf16.msra.mxu0 %v3946_v13  ;;  %2248 = vmatpush1.bf16.msra.mxu1 %v3949_v14  ;;  %v4021_v13 = vld [vmem:[#allocation7 + $0x728] ss:$16 sps:$4 sm:$0xff]   ;;  %v4026_v14 = vld [vmem:[#allocation7 + $0x744] ss:$16 sps:$4 sm:$0xff]  }
 0x1db   :  { %2085 = vmatprep.subr.bf16.mxu0 %v3954_v16  ;;  %2249 = vmatprep.subr.bf16.mxu1 %v3957_v17  ;;  %v4024_v16 = vld [vmem:[#allocation7 + $0x740] ss:$16 sps:$4 sm:$0xff]   ;;  %v4027_v17 = vld [vmem:[#allocation7 + $0x748] ss:$16 sps:$4 sm:$0xff]  }
 0x1de   :  { %2086 = vmatpush1.bf16.msra.mxu0 %v3952_v19  ;;  %2250 = vmatpush1.bf16.msra.mxu1 %v3955_v20  ;;  %v4035_v19 = vld [vmem:[#allocation7 + $0x76c] ss:$16 sps:$4 sm:$0xff]   ;;  %v4030_v20 = vld [vmem:[#allocation7 + $0x760] ss:$16 sps:$4 sm:$0xff]  }
 0x1df   :  { %2087 = vmatprep.subr.bf16.mxu0 %v3960_v26  ;;  %2251 = vmatprep.subr.bf16.mxu1 %v3963_v27  ;;  %v4038_v26 = vld [vmem:[#allocation7 + $0x784] ss:$16 sps:$4 sm:$0xff]   ;;  %v4041_v27 = vld [vmem:[#allocation7 + $0x78c] ss:$16 sps:$4 sm:$0xff]  }
 0x1e2   :  { %2088 = vmatpush1.bf16.msra.mxu0 %v3958_v29  ;;  %2252 = vmatpush1.bf16.msra.mxu1 %v3961_v60  ;;  %v4036_v29 = vld [vmem:[#allocation7 + $0x780] ss:$16 sps:$4 sm:$0xff]   ;;  %v4039_v60 = vld [vmem:[#allocation7 + $0x788] ss:$16 sps:$4 sm:$0xff]  }
 0x1e3   :  { %2098 = vmatprep.subr.bf16.mxu0 %v3966_v31  ;;  %2262 = vmatprep.subr.bf16.mxu1 %v3969_v32  ;;  %v4044_v31 = vld [vmem:[#allocation7 + $0x7a4] ss:$16 sps:$4 sm:$0xff]   ;;  %v4047_v32 = vld [vmem:[#allocation7 + $0x7ac] ss:$16 sps:$4 sm:$0xff]  }
 0x1e5   :  { %2090 = vmatmul.mubr.bf16.vlgmr.msra.gmra.mrb[0].mxu0 %v413_v36  ;;  %2254 = vmatmul.mubr.bf16.vlgmr.msra.gmra.mrb[16].mxu1 %v413_v36  ;;  %v4050_v36 = vld [vmem:[#allocation7 + $0x7c4] ss:$16 sps:$4 sm:$0xff]  }
 0x1e6   :  { %2099 = vmatpush1.bf16.msra.mxu0 %v3964_v34  ;;  %2263 = vmatpush1.bf16.msra.mxu1 %v3967_v35  ;;  %v4045_v34 = vld [vmem:[#allocation7 + $0x7a8] ss:$16 sps:$4 sm:$0xff]   ;;  %v387_v35 = vadd.f32 %v4599_v54, %v172_v30 }
 0x1e7   :  { %2100 = vmatprep.subr.bf16.mxu0 %v3972_v37  ;;  %2264 = vmatprep.subr.bf16.mxu1 %v3975_v38  ;;  %v4053_v37 = vld [vmem:[#allocation7 + $0x7cc] ss:$16 sps:$4 sm:$0xff]   ;;  %v4048_v38 = vld [vmem:[#allocation7 + $0x7c0] ss:$16 sps:$4 sm:$0xff]   ;;  %v4165_v30 = vld [vmem:[#allocation11 + $0x20] sm:$0xff]  }
 0x1e8   :  { %2130 = vmatprep.mubr.bf16.mxu0 %v416_v39  ;;  %2294 = vmatprep.mubr.bf16.mxu1 %v416_v39  ;;  %v4051_v39 = vld [vmem:[#allocation7 + $0x7c8] ss:$16 sps:$4 sm:$0xff]  }
 0x1e9   :  { %v4062_v54 = vld [vmem:[#allocation10 + $0x4] ss:$8 sps:$4 sm:$0xff]  }
 0x1ea   :  { %2101 = vmatpush1.bf16.msra.mxu0 %v3970_v40  ;;  %2265 = vmatpush1.bf16.msra.mxu1 %v3973_v41  ;;  %v399_v40 = vmul.f32 0.01, %v387_v35  ;;  %v4059_v41 = vld [vmem:[#allocation7 + $0x7ec] ss:$16 sps:$4 sm:$0xff]  }
 0x1eb   :  { %2102 = vmatprep.subr.bf16.mxu0 %v3978_v42  ;;  %2266 = vmatprep.subr.bf16.mxu1 %v3981_v45  ;;  %v4054_v42 = vld [vmem:[#allocation7 + $0x7e0] ss:$16 sps:$4 sm:$0xff]   ;;  %v4057_v45 = vld [vmem:[#allocation7 + $0x7e8] ss:$16 sps:$4 sm:$0xff]  }
 0x1ee   :  { %2103 = vmatpush1.bf16.msra.mxu0 %v3976_v46  ;;  %2267 = vmatpush1.bf16.msra.mxu1 %v3979_v47  ;;  %v407_v46 = vmax.f32 %v387_v35, %v399_v40  ;;  %v4060_v47 = vld [vmem:[#allocation10] ss:$8 sps:$4 sm:$0xff]  }
 0x1ef   :  { %2104 = vmatprep.subr.bf16.mxu0 %v3984_v48  ;;  %2268 = vmatprep.subr.bf16.mxu1 %v3987_v49  ;;  %v4065_v49 = vld [vmem:[#allocation10 + $0x14] ss:$8 sps:$4 sm:$0xff]  }
 0x1f0   :  { %v415_v48 = vpack.c.bf16 %v407_v46, %v407_v46 }
 0x1f2   :  { %2105 = vmatpush1.bf16.msra.mxu0 %v3982_v50  ;;  %2269 = vmatpush1.bf16.msra.mxu1 %v3985_v51  ;;  %v4063_v50 = vld [vmem:[#allocation10 + $0x10] ss:$8 sps:$4 sm:$0xff]   ;;  %v4068_v51 = vld [vmem:[#allocation10 + $0x24] ss:$8 sps:$4 sm:$0xff]  }
 0x1f3   :  { %2106 = vmatprep.subr.bf16.mxu0 %v3990_v52  ;;  %2270 = vmatprep.subr.bf16.mxu1 %v3993_v53  ;;  %v4066_v52 = vld [vmem:[#allocation10 + $0x20] ss:$8 sps:$4 sm:$0xff]   ;;  %v4071_v53 = vld [vmem:[#allocation10 + $0x34] ss:$8 sps:$4 sm:$0xff]  }
 0x1f6   :  { %2107 = vmatpush1.bf16.msra.mxu0 %v3988_v55  ;;  %2271 = vmatpush1.bf16.msra.mxu1 %v3991_v56  ;;  %v4069_v55 = vld [vmem:[#allocation10 + $0x30] ss:$8 sps:$4 sm:$0xff]   ;;  %v4074_v56 = vld [vmem:[#allocation10 + $0x44] ss:$8 sps:$4 sm:$0xff]  }
 0x1f7   :  { %2108 = vmatprep.subr.bf16.mxu0 %v3996_v57  ;;  %2272 = vmatprep.subr.bf16.mxu1 %v3999_v59  ;;  %v4072_v57 = vld [vmem:[#allocation10 + $0x40] ss:$8 sps:$4 sm:$0xff]   ;;  %v4077_v59 = vld [vmem:[#allocation10 + $0x54] ss:$8 sps:$4 sm:$0xff]  }
 0x1fa   :  { %2109 = vmatpush1.bf16.msra.mxu0 %v3994_v61  ;;  %2273 = vmatpush1.bf16.msra.mxu1 %v3997_v62  ;;  %v4075_v61 = vld [vmem:[#allocation10 + $0x50] ss:$8 sps:$4 sm:$0xff]   ;;  %v4080_v62 = vld [vmem:[#allocation10 + $0x64] ss:$8 sps:$4 sm:$0xff]  }
 0x1fb   :  { %2110 = vmatprep.subr.bf16.mxu0 %v4002_v0  ;;  %2274 = vmatprep.subr.bf16.mxu1 %v4005_v1  ;;  %v4078_v0 = vld [vmem:[#allocation10 + $0x60] ss:$8 sps:$4 sm:$0xff]   ;;  %v4083_v1 = vld [vmem:[#allocation10 + $0x74] ss:$8 sps:$4 sm:$0xff]  }
 0x1fe   :  { %2111 = vmatpush1.bf16.msra.mxu0 %v4000_v2  ;;  %2275 = vmatpush1.bf16.msra.mxu1 %v4003_v3  ;;  %v4081_v2 = vld [vmem:[#allocation10 + $0x70] ss:$8 sps:$4 sm:$0xff]   ;;  %v4086_v3 = vld [vmem:[#allocation10 + $0x84] ss:$8 sps:$4 sm:$0xff]  }
 0x1ff   :  { %2112 = vmatprep.subr.bf16.mxu0 %v4008_v4  ;;  %2276 = vmatprep.subr.bf16.mxu1 %v4011_v43  ;;  %v4084_v4 = vld [vmem:[#allocation10 + $0x80] ss:$8 sps:$4 sm:$0xff]   ;;  %v4089_v43 = vld [vmem:[#allocation10 + $0x94] ss:$8 sps:$4 sm:$0xff]  }
 0x202   :  { %2113 = vmatpush1.bf16.msra.mxu0 %v4006_v5  ;;  %2277 = vmatpush1.bf16.msra.mxu1 %v4009_v6  ;;  %v4087_v5 = vld [vmem:[#allocation10 + $0x90] ss:$8 sps:$4 sm:$0xff]   ;;  %v4092_v6 = vld [vmem:[#allocation10 + $0xa4] ss:$8 sps:$4 sm:$0xff]  }
 0x203   :  { %2114 = vmatprep.subr.bf16.mxu0 %v4014_v7  ;;  %2278 = vmatprep.subr.bf16.mxu1 %v4017_v63  ;;  %v4090_v7 = vld [vmem:[#allocation10 + $0xa0] ss:$8 sps:$4 sm:$0xff]   ;;  %v4095_v63 = vld [vmem:[#allocation10 + $0xb4] ss:$8 sps:$4 sm:$0xff]  }
 0x206   :  { %2115 = vmatpush1.bf16.msra.mxu0 %v4012_v8  ;;  %2279 = vmatpush1.bf16.msra.mxu1 %v4015_v9  ;;  %v4093_v8 = vld [vmem:[#allocation10 + $0xb0] ss:$8 sps:$4 sm:$0xff]   ;;  %v4098_v9 = vld [vmem:[#allocation10 + $0xc4] ss:$8 sps:$4 sm:$0xff]  }
 0x207   :  { %2116 = vmatprep.subr.bf16.mxu0 %v4020_v10  ;;  %2280 = vmatprep.subr.bf16.mxu1 %v4023_v11  ;;  %v4096_v10 = vld [vmem:[#allocation10 + $0xc0] ss:$8 sps:$4 sm:$0xff]   ;;  %v4101_v11 = vld [vmem:[#allocation10 + $0xd4] ss:$8 sps:$4 sm:$0xff]  }
 0x20a   :  { %2117 = vmatpush1.bf16.msra.mxu0 %v4018_v12  ;;  %2281 = vmatpush1.bf16.msra.mxu1 %v4021_v13  ;;  %v4099_v12 = vld [vmem:[#allocation10 + $0xd0] ss:$8 sps:$4 sm:$0xff]   ;;  %v4104_v13 = vld [vmem:[#allocation10 + $0xe4] ss:$8 sps:$4 sm:$0xff]  }
 0x20b   :  { %2118 = vmatprep.subr.bf16.mxu0 %v4026_v14  ;;  %2282 = vmatprep.subr.bf16.mxu1 %v4029_v15  ;;  %v4102_v14 = vld [vmem:[#allocation10 + $0xe0] ss:$8 sps:$4 sm:$0xff]   ;;  %v4107_v15 = vld [vmem:[#allocation10 + $0xf4] ss:$8 sps:$4 sm:$0xff]  }
 0x20e   :  { %2119 = vmatpush1.bf16.msra.mxu0 %v4024_v16  ;;  %2283 = vmatpush1.bf16.msra.mxu1 %v4027_v17  ;;  %v4105_v16 = vld [vmem:[#allocation10 + $0xf0] ss:$8 sps:$4 sm:$0xff]   ;;  %v4110_v17 = vld [vmem:[#allocation10 + $0x104] ss:$8 sps:$4 sm:$0xff]  }
 0x20f   :  { %2120 = vmatprep.subr.bf16.mxu0 %v4032_v18  ;;  %2284 = vmatprep.subr.bf16.mxu1 %v4035_v19  ;;  %v4156_v18 = vld [vmem:[#allocation11 + $0x40] sm:$0xff]  }
 0x210   :  { %v4157_v19 = vld [vmem:[#allocation11] sm:$0xff]  }
 0x212   :  { %2121 = vmatpush1.bf16.msra.mxu0 %v4030_v20  ;;  %2285 = vmatpush1.bf16.msra.mxu1 %v4033_v21  ;;  %v4158_v20 = vld [vmem:[#allocation11 + $0x48] sm:$0xff]  }
 0x213   :  { %2122 = vmatprep.subr.bf16.mxu0 %v4038_v26  ;;  %2286 = vmatprep.subr.bf16.mxu1 %v4041_v27  ;;  %v4159_v21 = vld [vmem:[#allocation11 + $0x8] sm:$0xff]   ;;  %v4160_v26 = vld [vmem:[#allocation11 + $0x50] sm:$0xff]  }
 0x214   :  { %v4161_v27 = vld [vmem:[#allocation11 + $0x10] sm:$0xff]  }
 0x216   :  { %2123 = vmatpush1.bf16.msra.mxu0 %v4036_v29  ;;  %2287 = vmatpush1.bf16.msra.mxu1 %v4039_v60  ;;  %v4163_v29 = vld [vmem:[#allocation11 + $0x18] sm:$0xff]   ;;  %v4164_v60 = vld [vmem:[#allocation11 + $0x60] sm:$0xff]  }
 0x217   :  { %2124 = vmatprep.subr.bf16.mxu0 %v4044_v31  ;;  %2288 = vmatprep.subr.bf16.mxu1 %v4047_v32  ;;  %v4166_v31 = vld [vmem:[#allocation11 + $0x68] sm:$0xff]   ;;  %v4614_v32 = vld [vmem:[#allocation8] sm:$0xf] }
 0x218   :  { %v690_v35 = vrot.slane %v4614_v32, %v159_v33  ;;  %v4108_v33 = vld [vmem:[#allocation10 + $0x100] ss:$8 sps:$4 sm:$0xff]  }
 0x21a   :  { %2125 = vmatpush1.bf16.msra.mxu0 %v4042_v58  ;;  %2289 = vmatpush1.bf16.msra.mxu1 %v4045_v34  ;;  %v678_v58 = vrot.slane %v4614_v32, %v4572_v23  ;;  %v682_v34 = vrot.slane %v4614_v32, %v4577_v25 }
 0x21b   :  { %2126 = vmatprep.subr.bf16.mxu0 %v4050_v36  ;;  %2290 = vmatprep.subr.bf16.mxu1 %v4053_v37 }
 0x21e   :  { %2127 = vmatpush1.bf16.msra.mxu0 %v4048_v38  ;;  %2291 = vmatpush1.bf16.msra.mxu1 %v4051_v39 }
 0x21f   :  { %2128 = vmatprep.subr.bf16.mxu0 %v4056_v24  ;;  %2292 = vmatprep.subr.bf16.mxu1 %v4059_v41 }
 0x222   :  { %2129 = vmatpush1.bf16.msra.mxu0 %v4054_v42  ;;  %2293 = vmatpush1.bf16.msra.mxu1 %v4057_v45 }
 0x223   :  { %2711 = vmatprep.subr.bf16.mxu0 %v4062_v54  ;;  %3557 = vmatprep.subr.bf16.mxu1 %v4156_v18  ;;  %v686_v18 = vrot.slane %v4614_v32, %v155_v44  ;;  %v4167_v44 = vld [vmem:[#allocation11 + $0x28] sm:$0xff]   ;;  %v4169_v32 = vld [vmem:[#allocation11 + $0x30] sm:$0xff]  }
 0x225   :  { %2131 = vmatmul.mubr.bf16.vlgmr.msra.gmra.mrb[0].mxu0 %v415_v48  ;;  %2295 = vmatmul.mubr.bf16.vlgmr.msra.gmra.mrb[16].mxu1 %v415_v48 }
 0x226   :  { %2712 = vmatpush1.bf16.msra.mxu0 %v4060_v47  ;;  %3558 = vmatpush3.bf16.msra.mxu1 %v4157_v19  ;;  %v4149_v19 = vld [vmem:[#allocation10 + $0x1d4] ss:$8 sps:$4 sm:$0xff]  }
 0x227   :  { %2713 = vmatprep.subr.bf16.mxu0 %v4065_v49  ;;  %3559 = vmatprep.subr.bf16.mxu1 %v4158_v20  ;;  %v4147_v20 = vld [vmem:[#allocation10 + $0x1d0] ss:$8 sps:$4 sm:$0xff]  }
 0x22a   :  { %2714 = vmatpush1.bf16.msra.mxu0 %v4063_v50  ;;  %3560 = vmatpush3.bf16.msra.mxu1 %v4159_v21 }
 0x22b   :  { %2715 = vmatprep.subr.bf16.mxu0 %v4068_v51  ;;  %3561 = vmatprep.subr.bf16.mxu1 %v4160_v26  ;;  %v4152_v26 = vld [vmem:[#allocation10 + $0x1e4] ss:$8 sps:$4 sm:$0xff]  }
 0x22e   :  { %2716 = vmatpush1.bf16.msra.mxu0 %v4066_v52  ;;  %3562 = vmatpush3.bf16.msra.mxu1 %v4161_v27  ;;  %v4150_v27 = vld [vmem:[#allocation10 + $0x1e0] ss:$8 sps:$4 sm:$0xff]  }
 0x22f   :  { %2717 = vmatprep.subr.bf16.mxu0 %v4071_v53  ;;  %3563 = vmatprep.subr.bf16.mxu1 %v4162_v28 }
 0x232   :  { %2718 = vmatpush1.bf16.msra.mxu0 %v4069_v55  ;;  %3564 = vmatpush3.bf16.msra.mxu1 %v4163_v29  ;;  %v4155_v29 = vld [vmem:[#allocation10 + $0x1f4] ss:$8 sps:$4 sm:$0xff]  }
 0x233   :  { %2719 = vmatprep.subr.bf16.mxu0 %v4074_v56  ;;  %3565 = vmatprep.subr.bf16.mxu1 %v4164_v60  ;;  %v4113_v56 = vld [vmem:[#allocation10 + $0x114] ss:$8 sps:$4 sm:$0xff]   ;;  %v4153_v60 = vld [vmem:[#allocation10 + $0x1f0] ss:$8 sps:$4 sm:$0xff]  }
 0x236   :  { %2720 = vmatpush1.bf16.msra.mxu0 %v4072_v57  ;;  %3566 = vmatpush3.bf16.msra.mxu1 %v4165_v30 }
 0x237   :  { %2721 = vmatprep.subr.bf16.mxu0 %v4077_v59  ;;  %3567 = vmatprep.subr.bf16.mxu1 %v4166_v31  ;;  %v4111_v59 = vld [vmem:[#allocation10 + $0x110] ss:$8 sps:$4 sm:$0xff]  }
 0x238   :  { %v4168_v31 = vld [vmem:[#allocation11 + $0x70] sm:$0xff]  }
 0x23a   :  { %2722 = vmatpush1.bf16.msra.mxu0 %v4075_v61  ;;  %v4116_v61 = vld [vmem:[#allocation10 + $0x124] ss:$8 sps:$4 sm:$0xff]   ;;  %3568 = vmatpush3.bf16.msra.mxu1 %v4167_v44 }
 0x23b   :  { %2723 = vmatprep.subr.bf16.mxu0 %v4080_v62  ;;  %v4114_v62 = vld [vmem:[#allocation10 + $0x120] ss:$8 sps:$4 sm:$0xff]   ;;  %3569 = vmatprep.subr.bf16.mxu1 %v4168_v31 }
 0x23e   :  { %2724 = vmatpush1.bf16.msra.mxu0 %v4078_v0  ;;  %v4119_v0 = vld [vmem:[#allocation10 + $0x134] ss:$8 sps:$4 sm:$0xff]   ;;  %3570 = vmatpush3.bf16.msra.mxu1 %v4169_v32 }
 0x23f   :  { %2725 = vmatprep.subr.bf16.mxu0 %v4083_v1  ;;  %v4117_v1 = vld [vmem:[#allocation10 + $0x130] ss:$8 sps:$4 sm:$0xff]  }
 0x242   :  { %2726 = vmatpush1.bf16.msra.mxu0 %v4081_v2  ;;  %v4122_v2 = vld [vmem:[#allocation10 + $0x144] ss:$8 sps:$4 sm:$0xff]  }
 0x243   :  { %2727 = vmatprep.subr.bf16.mxu0 %v4086_v3  ;;  %v4120_v3 = vld [vmem:[#allocation10 + $0x140] ss:$8 sps:$4 sm:$0xff]  }
 0x246   :  { %2728 = vmatpush1.bf16.msra.mxu0 %v4084_v4  ;;  %v4125_v4 = vld [vmem:[#allocation10 + $0x154] ss:$8 sps:$4 sm:$0xff]  }
 0x247   :  { %2729 = vmatprep.subr.bf16.mxu0 %v4089_v43  ;;  %v4123_v43 = vld [vmem:[#allocation10 + $0x150] ss:$8 sps:$4 sm:$0xff]  }
 0x24a   :  { %2730 = vmatpush1.bf16.msra.mxu0 %v4087_v5  ;;  %v4128_v5 = vld [vmem:[#allocation10 + $0x164] ss:$8 sps:$4 sm:$0xff]  }
 0x24b   :  { %2731 = vmatprep.subr.bf16.mxu0 %v4092_v6  ;;  %v4126_v6 = vld [vmem:[#allocation10 + $0x160] ss:$8 sps:$4 sm:$0xff]  }
 0x24e   :  { %2732 = vmatpush1.bf16.msra.mxu0 %v4090_v7  ;;  %v4131_v7 = vld [vmem:[#allocation10 + $0x174] ss:$8 sps:$4 sm:$0xff]  }
 0x24f   :  { %2733 = vmatprep.subr.bf16.mxu0 %v4095_v63  ;;  %v4129_v63 = vld [vmem:[#allocation10 + $0x170] ss:$8 sps:$4 sm:$0xff]  }
 0x252   :  { %2734 = vmatpush1.bf16.msra.mxu0 %v4093_v8  ;;  %v4134_v8 = vld [vmem:[#allocation10 + $0x184] ss:$8 sps:$4 sm:$0xff]  }
 0x253   :  { %2735 = vmatprep.subr.bf16.mxu0 %v4098_v9  ;;  %v4132_v9 = vld [vmem:[#allocation10 + $0x180] ss:$8 sps:$4 sm:$0xff]  }
 0x256   :  { %2736 = vmatpush1.bf16.msra.mxu0 %v4096_v10  ;;  %v4137_v10 = vld [vmem:[#allocation10 + $0x194] ss:$8 sps:$4 sm:$0xff]  }
 0x257   :  { %2737 = vmatprep.subr.bf16.mxu0 %v4101_v11  ;;  %v4135_v11 = vld [vmem:[#allocation10 + $0x190] ss:$8 sps:$4 sm:$0xff]  }
 0x25a   :  { %2738 = vmatpush1.bf16.msra.mxu0 %v4099_v12  ;;  %v4140_v12 = vld [vmem:[#allocation10 + $0x1a4] ss:$8 sps:$4 sm:$0xff]  }
 0x25b   :  { %2739 = vmatprep.subr.bf16.mxu0 %v4104_v13  ;;  %v4138_v13 = vld [vmem:[#allocation10 + $0x1a0] ss:$8 sps:$4 sm:$0xff]  }
 0x25e   :  { %2740 = vmatpush1.bf16.msra.mxu0 %v4102_v14  ;;  %v4143_v14 = vld [vmem:[#allocation10 + $0x1b4] ss:$8 sps:$4 sm:$0xff]  }
 0x25f   :  { %2741 = vmatprep.subr.bf16.mxu0 %v4107_v15  ;;  %v4141_v15 = vld [vmem:[#allocation10 + $0x1b0] ss:$8 sps:$4 sm:$0xff]  }
 0x262   :  { %2742 = vmatpush1.bf16.msra.mxu0 %v4105_v16  ;;  %v4146_v16 = vld [vmem:[#allocation10 + $0x1c4] ss:$8 sps:$4 sm:$0xff]  }
 0x263   :  { %2752 = vmatprep.subr.bf16.mxu0 %v4110_v17  ;;  %v4144_v17 = vld [vmem:[#allocation10 + $0x1c0] ss:$8 sps:$4 sm:$0xff]  }
 0x2f8   :  { %v2132_v36 = vpop.f32.mrb[0].mxu0  ;;  %v4623_v37 = vpop.f32.mrb[16].mxu1 }
 0x2f9   :  { %v3625_v38 = vadd.f32 %v2132_v36, %v678_v58  ;;  %v2134_v39 = vpop.f32.mrb[1].mxu0  ;;  %v2298_v40 = vpop.f32.mrb[17].mxu1  ;;  %v3627_v21 = vadd.f32 %v4623_v37, %v686_v18  ;;  %v4170_v58 = vld [vmem:[#allocation11 + $0x78] sm:$0xff]   ;;  %v2379_v36 = vld [vmem:[%s4710_s6] sm:$0x3] }
 0x2fa   :  { %v3626_v24 = vadd.f32 %v2134_v39, %v682_v34  ;;  %v3628_v41 = vadd.f32 %v2298_v40, %v690_v35  ;;  %v2136_v42 = vpop.f32.mrb[2].mxu0  ;;  %v2300_v45 = vpop.f32.mrb[18].mxu1  ;;  %v4171_v34 = vld [vmem:[#allocation11 + $0x38] sm:$0xff]   ;;  %3571 = vmatprep.subr.bf16.mxu1 %v4170_v58  ;;  %v4384_v35 = vmov 0.0   ;;  %v2384_v37 = vrot.slane %v2379_v36, %v4572_v23 }
 0x2fb   :  { %v2303_v46 = vmul.f32 0.01, %v3625_v38  ;;  %v2137_v54 = vpop.f32.mrb[3].mxu0  ;;  %v2301_v47 = vpop.f32.mrb[19].mxu1  ;;  %v2305_v28 = vmul.f32 0.01, %v3627_v21  ;;  %3572 = vmatpush3.bf16.msra.mxu1 %v4171_v34 }
 0x2fc   :  { %v2304_v48 = vmul.f32 0.01, %v3626_v24  ;;  %v2306_v49 = vmul.f32 0.01, %v3628_v41  ;;  %3593 = vmatprep.subr.bf16.mxu1 %v4384_v35  ;;  %v4173_v23 = vld [vmem:[%s4713_s9 + $0x8] sm:$0xff]  }
 0x2fd   :  { %v2307_v50 = vmax.f32 %v3625_v38, %v2303_v46  ;;  %v2309_v30 = vmax.f32 %v3627_v21, %v2305_v28  ;;  %v2388_v38 = vrot.slane %v2379_v36, %v4577_v25  ;;  %v4174_v25 = vld [vmem:[%s4713_s9 + $0x10] sm:$0xff]  }
 0x2fe   :  { %v2308_v51 = vmax.f32 %v3626_v24, %v2304_v48  ;;  %v2310_v52 = vmax.f32 %v3628_v41, %v2306_v49 }
 0x2ff   :  { %v2311_v55 = vpack.c.bf16 %v2307_v50, %v2307_v50  ;;  %v2313_v22 = vpack.c.bf16 %v2309_v30, %v2309_v30  ;;  %v4172_v50 = vld [vmem:[%s4713_s9] sm:$0xff]  }
 0x300   :  { %v2312_v53 = vpack.c.bf16 %v2308_v51, %v2308_v51  ;;  %v2314_v57 = vpack.c.bf16 %v2310_v52, %v2310_v52  ;;  %v4175_v52 = vld [vmem:[%s4713_s9 + $0x18] sm:$0xff]  }
 0x302   :  { %2743 = vmatprep.mubr.bf16.mxu0 %v2312_v53  ;;  %v4176_v53 = vld [vmem:[%s4713_s9 + $0x20] sm:$0xff]  }
 0x303   :  { %2744 = vmatmul.mubr.bf16.vlgmr.msra.gmra.mrb[4].mxu0 %v2311_v55  ;;  %v4178_v55 = vld [vmem:[%s4713_s9 + $0x30] sm:$0xff]  }
 0x304   :  { %2753 = vmatpush1.bf16.msra.mxu0 %v4108_v33  ;;  %2784 = vmatprep.mubr.bf16.mxu0 %v2314_v57  ;;  %v4177_v33 = vld [vmem:[%s4713_s9 + $0x28] sm:$0xff]  }
 0x305   :  { %2754 = vmatprep.subr.bf16.mxu0 %v4113_v56  ;;  %v4179_v56 = vld [vmem:[%s4713_s9 + $0x38] sm:$0xff]  }
 0x308   :  { %2755 = vmatpush1.bf16.msra.mxu0 %v4111_v59  ;;  %v3525_v59 = vld [vmem:[#allocation13] ss:$0 sm:$0xff] }
 0x309   :  { %2756 = vmatprep.subr.bf16.mxu0 %v4116_v61 }
 0x30c   :  { %2757 = vmatpush1.bf16.msra.mxu0 %v4114_v62 }
 0x30d   :  { %2758 = vmatprep.subr.bf16.mxu0 %v4119_v0 }
 0x310   :  { %2759 = vmatpush1.bf16.msra.mxu0 %v4117_v1 }
 0x311   :  { %2760 = vmatprep.subr.bf16.mxu0 %v4122_v2 }
 0x314   :  { %2761 = vmatpush1.bf16.msra.mxu0 %v4120_v3 }
 0x315   :  { %2762 = vmatprep.subr.bf16.mxu0 %v4125_v4 }
 0x318   :  { %2763 = vmatpush1.bf16.msra.mxu0 %v4123_v43  ;;  %v4180_v43 = vld [vmem:[%s4715_s11] sm:$0xff]  }
 0x319   :  { %2764 = vmatprep.subr.bf16.mxu0 %v4128_v5 }
 0x31c   :  { %2765 = vmatpush1.bf16.msra.mxu0 %v4126_v6  ;;  %v4181_v6 = vld [vmem:[%s4715_s11 + $0x8] sm:$0xff]  }
 0x31d   :  { %2766 = vmatprep.subr.bf16.mxu0 %v4131_v7  ;;  %v4182_v7 = vld [vmem:[%s4715_s11 + $0x10] sm:$0xff]  }
 0x320   :  { %2767 = vmatpush1.bf16.msra.mxu0 %v4129_v63  ;;  %v4183_v63 = vld [vmem:[%s4715_s11 + $0x18] sm:$0xff]   ;;  %s4386_s11 = smov [#allocation14]  }
 0x321   :  { %2768 = vmatprep.subr.bf16.mxu0 %v4134_v8  ;;  %v3542_v8 = vld [vmem:[%s4714_s10] ss:$0 sm:$0xff]  ;;  %s3181_s15 = sshll.u32 %s4386_s11, 4  ;;  %s3182_s15 = int_to_ptr.vmem [resolvable:$true] %s3181_s15 }
 0x322   :  { %s4338_s10 = scalar_lea.vmem %s3182_s15, 128  ;;  %p4343_p1 = scmp.lt.s32.totalorder %s3182_s15, %s3182_s15 }
 0x323   :  { %p4339_p0 = scmp.ne.s32.totalorder %s3182_s15, %s4338_s10  ;;  %p4344_p2 = scmp.lt.s32.totalorder %s4338_s10, %s4338_s10 }
 0x324   :  { %2769 = vmatpush1.bf16.msra.mxu0 %v4132_v9 }
 0x325   :  { %2770 = vmatprep.subr.bf16.mxu0 %v4137_v10  ;;  %p4345_p3 = por %p4344_p2, %p4343_p1 }
 0x327   :  { %p4346_p4 = pnand %p4345_p3, %p4339_p0 }
 0x328   :  { %2771 = vmatpush1.bf16.msra.mxu0 %v4135_v11 }
 0x329   :  { %2772 = vmatprep.subr.bf16.mxu0 %v4140_v12 }
 0x32c   :  { %2773 = vmatpush1.bf16.msra.mxu0 %v4138_v13 }
 0x32d   :  { %2774 = vmatprep.subr.bf16.mxu0 %v4143_v14 }
 0x330   :  { %2775 = vmatpush1.bf16.msra.mxu0 %v4141_v15 }
 0x331   :  { %2776 = vmatprep.subr.bf16.mxu0 %v4146_v16 }
 0x334   :  { %2777 = vmatpush1.bf16.msra.mxu0 %v4144_v17  ;;  %v3551_v17 = vld [vmem:[%s4716_s12] ss:$0 sm:$0xff] }
 0x335   :  { %2778 = vmatprep.subr.bf16.mxu0 %v4149_v19 }
 0x338   :  { %2779 = vmatpush1.bf16.msra.mxu0 %v4147_v20 }
 0x339   :  { %2780 = vmatprep.subr.bf16.mxu0 %v4152_v26 }
 0x33c   :  { %2781 = vmatpush1.bf16.msra.mxu0 %v4150_v27 }
 0x33d   :  { %2782 = vmatprep.subr.bf16.mxu0 %v4155_v29 }
 0x340   :  { %2783 = vmatpush1.bf16.msra.mxu0 %v4153_v60 }
 0x343   :  { %2785 = vmatmul.mubr.bf16.vlgmr.msra.gmra.mrb[4].mxu0 %v2313_v22 }
 0x416   :  { %v2786_v39 = vpop.f32.mrb[4].mxu0 }
 0x417   :  { %v3629_v40 = vadd.f32 %v2786_v39, %v2384_v37  ;;  %v2788_v24 = vpop.f32.mrb[5].mxu0 }
 0x418   :  { %v3630_v41 = vadd.f32 %v2788_v24, %v2388_v38  ;;  %v2790_v42 = vpop.f32.mrb[6].mxu0 }
 0x419   :  { %v2793_v45 = vmul.f32 0.01, %v3629_v40  ;;  %v2791_v46 = vpop.f32.mrb[7].mxu0 }
 0x41a   :  { %v2794_v54 = vmul.f32 0.01, %v3630_v41 }
 0x41b   :  { %v2795_v47 = vmax.f32 %v3629_v40, %v2793_v45 }
 0x41c   :  { %v2796_v48 = vmax.f32 %v3630_v41, %v2794_v54 }
 0x41d   :  { %v2797_v51 = vpack.c.bf16 %v2795_v47, %v2795_v47 }
 0x41e   :  { %v2798_v49 = vpack.c.bf16 %v2796_v48, %v2796_v48 }
 0x420   :  { %2966 = vmatprep.mubr.bf16.mxu1 %v2798_v49 }
 0x421   :  { %2967 = vmatmul.mubr.bf16.vlgmr.msra.gmra.mrb[20].mxu1 %v2797_v51 }
 0x422   :  { %3594 = vmatpush3.bf16.msra.mxu1 %v4172_v50  ;;  %3609 = vmatprep.mubr.msk.bf16.mxu1 %vm4385_vm1, %v4384_v35 }
 0x423   :  { %3595 = vmatprep.subr.bf16.mxu1 %v4384_v35 }
 0x426   :  { %3596 = vmatpush3.bf16.msra.mxu1 %v4173_v23 }
 0x427   :  { %3597 = vmatprep.subr.bf16.mxu1 %v4384_v35 }
 0x42a   :  { %3598 = vmatpush3.bf16.msra.mxu1 %v4174_v25 }
 0x42b   :  { %3599 = vmatprep.subr.bf16.mxu1 %v4384_v35 }
 0x42e   :  { %3600 = vmatpush3.bf16.msra.mxu1 %v4175_v52 }
 0x42f   :  { %3601 = vmatprep.subr.bf16.mxu1 %v4384_v35 }
 0x432   :  { %3602 = vmatpush3.bf16.msra.mxu1 %v4176_v53 }
 0x433   :  { %3603 = vmatprep.subr.bf16.mxu1 %v4384_v35 }
 0x436   :  { %3604 = vmatpush3.bf16.msra.mxu1 %v4177_v33 }
 0x437   :  { %3605 = vmatprep.subr.bf16.mxu1 %v4384_v35 }
 0x43a   :  { %3606 = vmatpush3.bf16.msra.mxu1 %v4178_v55 }
 0x43b   :  { %3607 = vmatprep.subr.bf16.mxu1 %v4384_v35 }
 0x43e   :  { %3608 = vmatpush3.bf16.msra.mxu1 %v4179_v56 }
 0x43f   :  { %3613 = vmatprep.subr.bf16.mxu1 %v4384_v35 }
 0x4f4   :  { %v3573_v57 = vpop.f32.mrb[20].mxu1 }
 0x4f5   :  { %v3574_v61 = vpop.f32.mrb[21].mxu1 }
 0x4f6   :  { %v3575_v62 = vadd.f32 %v3574_v61, %v3573_v57  ;;  %v3576_v0 = vpop.f32.mrb[22].mxu1 }
 0x4f7   :  { %v3577_v1 = vpop.f32.mrb[23].mxu1 }
 0x4f8   :  { %v2969_v2 = vadd.f32 %v3575_v62, %v3525_v59 }
 0x4fa   :  { %v2974_v3 = vmul.f32 0.01, %v2969_v2 }
 0x4fc   :  { %v2975_v4 = vmax.f32 %v2969_v2, %v2974_v3 }
 0x4fe   :  { %v2976_v5 = vpack.c.bf16 %v2975_v4, %v2975_v4 }
 0x500   :  { %3610 = vmatmul.mubr.bf16.vlgmr.msra.gmra.mrb[24].mxu1 %v2976_v5 }
 0x501   :  { %3614 = vmatpush3.bf16.msra.mxu1 %v4180_v43  ;;  %3621 = vmatprep.mubr.msk.bf16.mxu1 %vm4385_vm1, %v4384_v35 }
 0x502   :  { %3615 = vmatprep.subr.bf16.mxu1 %v4384_v35 }
 0x505   :  { %3616 = vmatpush3.bf16.msra.mxu1 %v4181_v6 }
 0x506   :  { %3617 = vmatprep.subr.bf16.mxu1 %v4384_v35 }
 0x509   :  { %3618 = vmatpush3.bf16.msra.mxu1 %v4182_v7 }
 0x50a   :  { %3619 = vmatprep.subr.bf16.mxu1 %v4384_v35 }
 0x50d   :  { %3620 = vmatpush3.bf16.msra.mxu1 %v4183_v63 }
 0x5d3   :  { %v3082_v9 = vpop.f32.mrb[24].mxu1 }
 0x5d4   :  { %v3083_v10 = vadd.f32 %v3542_v8, %v3082_v9  ;;  %v3611_v11 = vpop.f32.mrb[25].mxu1 }
 0x5d5   :  { %v3085_v12 = vpop.f32.mrb[26].mxu1 }
 0x5d6   :  { %v3088_v13 = vmul.f32 0.01, %v3083_v10  ;;  %v3612_v14 = vpop.f32.mrb[27].mxu1 }
 0x5d8   :  { %v3089_v15 = vmax.f32 %v3083_v10, %v3088_v13 }
 0x5da   :  { %v3090_v16 = vpack.c.bf16 %v3089_v15, %v3089_v15 }
 0x5dc   :  { %3622 = vmatmul.mubr.msk.bf16.vlgmr.msra.gmra.mrb[28].mxu1 %vm3130_vm2, %v3090_v16 }
 0x6af   :  { %v3168_v18 = vpop.f32.mrb[28].mxu1 }
 0x6b0   :  { %v3169_v19 = vadd.f32 %v3551_v17, %v3168_v18  ;;  %v3623_v20 = vpop.f32.mrb[29].mxu1 }
 0x6b1   :  { %v3171_v21 = vpop.f32.mrb[30].mxu1 }
 0x6b2   :  { %3174 = vst [vmem:[#allocation14] sm:$0xff] %v3169_v19  ;;  %v3624_v26 = vpop.f32.mrb[31].mxu1 }
 0x6b3   :  { %4349 = shalt.err (!%p4346_p4)
}
 0x6b4   :  { %s4350_s12 = scalar_lea.hbm %s4717_s13, 128 }
 0x6b5   :  { %p4351_p5 = scmp.ne.s32.totalorder %s4717_s13, %s4350_s12  ;;  %p4354_p6 = scmp.lt.u32.totalorder %s4350_s12, %s4717_s13 }
 0x6b7   :  { %p4356_p7 = pnand %p4354_p6, %p4351_p5 }
 0x6b9   :  { %4359 = shalt.err (!%p4356_p7)
}
 0x6ba   :  { %3184 = dma.vmem_to_hbm [thread:$0]  %s3182_s15, 128, %s4717_s13, [#allocation4]  }
 0x6bb   :  { %4368 = dma.done.wait [#allocation4], 128  }
 0x6bc   :  { %4369 = vsyncadd [#allocation4], 4294967168 }
 0x6bd   :  { %3188 = vsyncpa [#allocation3], 1 }
 0x6be   :  { %3189 = vsyncpa [#allocation6], 1 }
 0x6bf   :  { %3190 = vsyncpa [#allocation9], 1 }
 0x6c0   :  { %3191 = vsyncpa [#allocation12], 1 }
 0x6c1   :  { %3192 = vsyncpa [#allocation4], 1 }

</bundles_post_ra>
